<compile_context>
chip_gen: v6e
topology: v6e:2x2x1
jax: 0.10.0
libtpu: 0.0.40
codegen_flags: <defaults>
</compile_context>

<pallas_src>
import functools
import math

import jax
import jax.numpy as jnp
from jax.experimental import pallas as pl
from jax.experimental.pallas import tpu as pltpu

EPS = 1e-5
COMPUTE_DTYPE = jnp.bfloat16          # MXU operand dtype (accumulation is f32)
VMEM_LIMIT = 48 * 1024 * 1024         # explicit scoped-VMEM cap, headroom on v7x


# ----------------------------------------------------------------------------- 
# tile helpers (static, run at trace time)
# -----------------------------------------------------------------------------
def _pick_row_tile(n, target=512):
    """Largest multiple-of-8 divisor of n that is <= target (else n itself)."""
    if n <= target:
        return n
    best = n
    for t in range(8, target + 1, 8):
        if n % t == 0:
            best = t
    return best


def _pick_col_tile(n, target=512):
    """Largest multiple-of-128 divisor of n that is <= target (else n itself)."""
    if n <= 1024:
        return n
    best = n
    for t in range(128, target + 1, 128):
        if n % t == 0:
            best = t
    return best


def _bytes(*arrs):
    return int(sum(a.size * a.dtype.itemsize for a in arrs))


# -----------------------------------------------------------------------------
# kernels
# -----------------------------------------------------------------------------
def _layernorm(x, gamma, beta, inv_d):
    """LayerNorm over the last axis. f32 stats, single reduction pass."""
    s = jnp.sum(x, axis=-1, keepdims=True)
    ss = jnp.sum(x * x, axis=-1, keepdims=True)
    mean = s * inv_d
    var = jnp.maximum(ss * inv_d - mean * mean, 0.0)
    return (x - mean) * jax.lax.rsqrt(var + EPS) * gamma + beta


def _prenorm_matmul_kernel(x_ref, g_ref, b_ref, w_ref, o_ref, *, inv_d):
    """LN(x) @ W  (no bias) — used for the QKV projection."""
    x = x_ref[...].astype(jnp.float32)
    y = _layernorm(x, g_ref[...], b_ref[...], inv_d)
    o_ref[...] = jnp.dot(y.astype(w_ref.dtype), w_ref[...],
                         preferred_element_type=jnp.float32).astype(o_ref.dtype)


def _attention_kernel(q_ref, k_ref, v_ref, o_ref, *, scale):
    """softmax(q k^T * scale) v for one (batch*head); query rows tiled.

    The torch module builds `mask = rand(N, N) <= 1`, which is always True,
    so no masking is applied here.
    """
    q = q_ref[...].astype(COMPUTE_DTYPE)
    k = k_ref[...].astype(COMPUTE_DTYPE)
    v = v_ref[...].astype(COMPUTE_DTYPE)
    # q (TQ, Dh) contracted with k (N, Dh) over the feature axis -> (TQ, N)
    s = jax.lax.dot_general(q, k, (((1,), (1,)), ((), ())),
                            preferred_element_type=jnp.float32) * scale
    m = jnp.max(s, axis=-1, keepdims=True)
    p = jnp.exp(s - m)
    denom = jnp.sum(p, axis=-1, keepdims=True)
    p = p * pl.reciprocal(denom, approx=True)
    o_ref[...] = jnp.dot(p.astype(COMPUTE_DTYPE), v,
                         preferred_element_type=jnp.float32).astype(o_ref.dtype)
    # TODO(synk): for long sequences switch to a flash-style K/V-streaming loop
    # instead of keeping full K/V per head resident.


def _matmul_bias_residual_kernel(a_ref, w_ref, b_ref, r_ref, o_ref):
    """a @ W + b + residual — attention output projection (to_out)."""
    out = jnp.dot(a_ref[...].astype(w_ref.dtype), w_ref[...],
                  preferred_element_type=jnp.float32)
    out = out + b_ref[...] + r_ref[...].astype(jnp.float32)
    o_ref[...] = out.astype(o_ref.dtype)


def _prenorm_ffn_residual_kernel(x_ref, g_ref, beta_ref, w1_ref, b1_ref,
                                 w2_ref, b2_ref, o_ref, *, inv_d):
    """LN -> Linear -> SiLU -> Linear -> + residual (dropout p=0 is identity)."""
    x = x_ref[...].astype(jnp.float32)
    y = _layernorm(x, g_ref[...], beta_ref[...], inv_d)
    h = jnp.dot(y.astype(w1_ref.dtype), w1_ref[...],
                preferred_element_type=jnp.float32) + b1_ref[...]
    h = h * (1.0 / (1.0 + jnp.exp(-h)))                  # SiLU in f32
    out = jnp.dot(h.astype(w2_ref.dtype), w2_ref[...],
                  preferred_element_type=jnp.float32) + b2_ref[...] + x
    o_ref[...] = out.astype(o_ref.dtype)
    # TODO(synk): for very large D*mlp_dim, tile the hidden/output columns so
    # both FFN weights need not be VMEM-resident simultaneously.


# -----------------------------------------------------------------------------
# pallas_call wrappers
# -----------------------------------------------------------------------------
def prenorm_qkv_proj(x2, gamma, beta, w):
    T, D = x2.shape
    OUT = w.shape[1]
    tm = _pick_row_tile(T)
    tn = _pick_col_tile(OUT)
    g2 = gamma.reshape(1, D).astype(jnp.float32)
    b2 = beta.reshape(1, D).astype(jnp.float32)
    wc = w.astype(COMPUTE_DTYPE)
    kern = functools.partial(_prenorm_matmul_kernel, inv_d=1.0 / D)
    cost = pl.CostEstimate(flops=2 * T * D * OUT, transcendentals=T,
                           bytes_accessed=_bytes(x2, wc) + T * OUT * 4 + 2 * D * 4)
    return pl.pallas_call(
        kern,
        out_shape=jax.ShapeDtypeStruct((T, OUT), jnp.float32),
        grid_spec=pltpu.PrefetchScalarGridSpec(
            num_scalar_prefetch=0,
            # W-column axis outermost: each W slab is reused across all row tiles.
            grid=(OUT // tn, T // tm),
            in_specs=[
                pl.BlockSpec((tm, D), lambda ci, ri: (ri, 0)),
                pl.BlockSpec((1, D), lambda ci, ri: (0, 0)),
                pl.BlockSpec((1, D), lambda ci, ri: (0, 0)),
                pl.BlockSpec((D, tn), lambda ci, ri: (0, ci)),
            ],
            out_specs=pl.BlockSpec((tm, tn), lambda ci, ri: (ri, ci)),
        ),
        compiler_params=pltpu.CompilerParams(
            dimension_semantics=("parallel", "parallel"),
            vmem_limit_bytes=VMEM_LIMIT),
        cost_estimate=cost,
    )(x2, g2, b2, wc)


def attention(q, k, v):
    BH, N, Dh = q.shape
    # Standard SDPA scaling: 1/sqrt(q.shape[-1]) = 1/sqrt(C*dim_head)
    # (the module's unused self.scale would be dim_head**-0.5).
    scale = 1.0 / math.sqrt(Dh)
    tq = _pick_row_tile(N, target=256)
    kern = functools.partial(_attention_kernel, scale=scale)
    cost = pl.CostEstimate(flops=4 * BH * N * N * Dh, transcendentals=BH * N * N,
                           bytes_accessed=_bytes(q, k, v) + BH * N * Dh * 4)
    return pl.pallas_call(
        kern,
        out_shape=jax.ShapeDtypeStruct((BH, N, Dh), jnp.float32),
        grid_spec=pltpu.PrefetchScalarGridSpec(
            num_scalar_prefetch=0,
            grid=(BH, N // tq),
            in_specs=[
                pl.BlockSpec((pl.Squeezed(), tq, Dh), lambda b, qi: (b, qi, 0)),
                pl.BlockSpec((pl.Squeezed(), N, Dh), lambda b, qi: (b, 0, 0)),
                pl.BlockSpec((pl.Squeezed(), N, Dh), lambda b, qi: (b, 0, 0)),
            ],
            out_specs=pl.BlockSpec((pl.Squeezed(), tq, Dh),
                                   lambda b, qi: (b, qi, 0)),
        ),
        compiler_params=pltpu.CompilerParams(
            dimension_semantics=("parallel", "parallel"),
            vmem_limit_bytes=VMEM_LIMIT),
        cost_estimate=cost,
    )(q, k, v)


def proj_bias_residual(a, w, b, res):
    T, K = a.shape
    D = w.shape[1]
    tm = _pick_row_tile(T)
    wc = w.astype(COMPUTE_DTYPE)
    b2 = b.reshape(1, D).astype(jnp.float32)
    cost = pl.CostEstimate(flops=2 * T * K * D, transcendentals=0,
                           bytes_accessed=_bytes(a, wc, res) + T * D * 4)
    return pl.pallas_call(
        _matmul_bias_residual_kernel,
        out_shape=jax.ShapeDtypeStruct((T, D), res.dtype),
        grid_spec=pltpu.PrefetchScalarGridSpec(
            num_scalar_prefetch=0,
            grid=(T // tm,),
            in_specs=[
                pl.BlockSpec((tm, K), lambda ri: (ri, 0)),
                pl.BlockSpec((K, D), lambda ri: (0, 0)),
                pl.BlockSpec((1, D), lambda ri: (0, 0)),
                pl.BlockSpec((tm, D), lambda ri: (ri, 0)),
            ],
            out_specs=pl.BlockSpec((tm, D), lambda ri: (ri, 0)),
        ),
        compiler_params=pltpu.CompilerParams(
            dimension_semantics=("parallel",),
            vmem_limit_bytes=VMEM_LIMIT),
        cost_estimate=cost,
    )(a, wc, b2, res)


def prenorm_ffn_residual(x2, gamma, beta, w1, b1, w2, b2):
    T, D = x2.shape
    H = w1.shape[1]
    tm = _pick_row_tile(T)
    w1c = w1.astype(COMPUTE_DTYPE)
    w2c = w2.astype(COMPUTE_DTYPE)
    g2 = gamma.reshape(1, D).astype(jnp.float32)
    be2 = beta.reshape(1, D).astype(jnp.float32)
    b1r = b1.reshape(1, H).astype(jnp.float32)
    b2r = b2.reshape(1, D).astype(jnp.float32)
    kern = functools.partial(_prenorm_ffn_residual_kernel, inv_d=1.0 / D)
    cost = pl.CostEstimate(flops=4 * T * D * H, transcendentals=T * (H + 1),
                           bytes_accessed=_bytes(x2, w1c, w2c) + T * D * 4)
    return pl.pallas_call(
        kern,
        out_shape=jax.ShapeDtypeStruct((T, D), x2.dtype),
        grid_spec=pltpu.PrefetchScalarGridSpec(
            num_scalar_prefetch=0,
            grid=(T // tm,),
            in_specs=[
                pl.BlockSpec((tm, D), lambda ri: (ri, 0)),
                pl.BlockSpec((1, D), lambda ri: (0, 0)),
                pl.BlockSpec((1, D), lambda ri: (0, 0)),
                pl.BlockSpec((D, H), lambda ri: (0, 0)),
                pl.BlockSpec((1, H), lambda ri: (0, 0)),
                pl.BlockSpec((H, D), lambda ri: (0, 0)),
                pl.BlockSpec((1, D), lambda ri: (0, 0)),
            ],
            out_specs=pl.BlockSpec((tm, D), lambda ri: (ri, 0)),
        ),
        compiler_params=pltpu.CompilerParams(
            dimension_semantics=("parallel",),
            vmem_limit_bytes=VMEM_LIMIT),
        cost_estimate=cost,
    )(x2, g2, be2, w1c, b1r, w2c, b2r)


# -----------------------------------------------------------------------------
# full Transformer forward
# -----------------------------------------------------------------------------
@functools.partial(jax.jit, static_argnames=("heads", "dim_head"))
def transformer_forward(x, params, *, heads, dim_head):
    B, C, N, D = x.shape
    T = B * C * N
    inner = heads * dim_head
    x2 = x.reshape(T, D)                                   # lane-dense token slab
    for p in params:
        # --- attention block: x = to_out(Attention(LN(x))) + x ---
        qkv = prenorm_qkv_proj(x2, p["ln1_g"], p["ln1_b"], p["w_qkv"])   # (T, 3*inner)
        # einops 'b c n (3 h d) -> 3 (b h) n (c d)'
        qkv = qkv.reshape(B, C, N, 3, heads, dim_head)
        qkv = jnp.transpose(qkv, (3, 0, 4, 2, 1, 5)).reshape(
            3, B * heads, N, C * dim_head)
        attn = attention(qkv[0], qkv[1], qkv[2])                         # (B*H, N, C*dh)
        # einops '(b h) n (c d) -> b c n (h d)'
        attn = attn.reshape(B, heads, N, C, dim_head)
        attn = jnp.transpose(attn, (0, 3, 2, 1, 4)).reshape(T, inner)
        x2 = proj_bias_residual(attn, p["w_out"], p["b_out"], x2)        # (T, D)
        # --- feed-forward block: x = FF(LN(x)) + x ---
        x2 = prenorm_ffn_residual(x2, p["ln2_g"], p["ln2_b"],
                                  p["w1"], p["b1"], p["w2"], p["b2"])
    return x2.reshape(B, C, N, D)


# -----------------------------------------------------------------------------
# pure-JAX f32 reference (mirrors the torch forward)
# -----------------------------------------------------------------------------
def _reference(x, params, heads, dim_head):
    B, C, N, D = x.shape
    xf = x.astype(jnp.float32)

    def ln(t, g, b):
        m = jnp.mean(t, axis=-1, keepdims=True)
        v = jnp.mean((t - m) ** 2, axis=-1, keepdims=True)
        return (t - m) / jnp.sqrt(v + EPS) * g + b

    for p in params:
        y = ln(xf, p["ln1_g"], p["ln1_b"])
        qkv = y @ p["w_qkv"]
        qkv = qkv.reshape(B, C, N, 3, heads, dim_head)
        qkv = jnp.transpose(qkv, (3, 0, 4, 2, 1, 5)).reshape(
            3, B * heads, N, C * dim_head)
        q, k, v = qkv[0], qkv[1], qkv[2]
        s = jnp.einsum("bnd,bmd->bnm", q, k) / math.sqrt(C * dim_head)
        a = jax.nn.softmax(s, axis=-1)
        o = jnp.einsum("bnm,bmd->bnd", a, v)
        o = o.reshape(B, heads, N, C, dim_head)
        o = jnp.transpose(o, (0, 3, 2, 1, 4)).reshape(B, C, N, heads * dim_head)
        xf = o @ p["w_out"] + p["b_out"] + xf
        y = ln(xf, p["ln2_g"], p["ln2_b"])
        h = y @ p["w1"] + p["b1"]
        h = h * jax.nn.sigmoid(h)
        xf = h @ p["w2"] + p["b2"] + xf
    return xf


# -----------------------------------------------------------------------------
# main
# -----------------------------------------------------------------------------
if __name__ == "__main__":
    B, C, N = 2, 4, 8
    dim, heads, dim_head, mlp_dim, depth = 32, 4, 8, 64, 2
    inner = heads * dim_head

    key = jax.random.PRNGKey(0)
    key, kx = jax.random.split(key)
    x = jax.random.normal(kx, (B, C, N, dim), dtype=jnp.float32)

    params = []
    for _ in range(depth):
        key, k1, k2, k3, k4, k5, k6, k7 = jax.random.split(key, 8)
        params.append(dict(
            ln1_g=jnp.ones((dim,), jnp.float32),
            ln1_b=jnp.zeros((dim,), jnp.float32),
            w_qkv=jax.random.normal(k1, (dim, 3 * inner), jnp.float32) / math.sqrt(dim),
            w_out=jax.random.normal(k2, (inner, dim), jnp.float32) / math.sqrt(inner),
            b_out=jax.random.normal(k3, (dim,), jnp.float32) * 0.02,
            ln2_g=jnp.ones((dim,), jnp.float32),
            ln2_b=jnp.zeros((dim,), jnp.float32),
            w1=jax.random.normal(k4, (dim, mlp_dim), jnp.float32) / math.sqrt(dim),
            b1=jax.random.normal(k5, (mlp_dim,), jnp.float32) * 0.02,
            w2=jax.random.normal(k6, (mlp_dim, dim), jnp.float32) / math.sqrt(mlp_dim),
            b2=jax.random.normal(k7, (dim,), jnp.float32) * 0.02,
        ))

    out = transformer_forward(x, params, heads=heads, dim_head=dim_head)
    out = jax.block_until_ready(out)

    ref = _reference(x, params, heads, dim_head)
    assert out.shape == x.shape
    assert bool(jnp.all(jnp.isfinite(out)))
    rel_err = float(jnp.linalg.norm(out - ref) / (jnp.linalg.norm(ref) + 1e-12))
    # bf16 MXU operands + approx softmax reciprocal -> expect <~1% deviation vs f32.
    assert rel_err < 3e-2, f"relative error too large: {rel_err}"

    print("KERNEL_OK")
</pallas_src>

<mosaic_0001>
module attributes {stable_mosaic.version = 11 : i64} {
  func.func @_prenorm_matmul_kernel(%arg0: i32, %arg1: i32, %arg2: memref<64x32xf32, #tpu.memory_space<vmem>>, %arg3: memref<1x32xf32, #tpu.memory_space<vmem>>, %arg4: memref<1x32xf32, #tpu.memory_space<vmem>>, %arg5: memref<32x96xbf16, #tpu.memory_space<vmem>>, %arg6: memref<64x96xf32, #tpu.memory_space<vmem>>) attributes {dimension_semantics = [#tpu.dimension_semantics<parallel>, #tpu.dimension_semantics<parallel>], iteration_bounds = array<i64: 1, 1>, scalar_prefetch = 0 : i64, scratch_operands = 0 : i64, tpu.core_type = #tpu.core_type<tc>, window_params = [{transform_indices = @transform_0, window_bounds = array<i64: 64, 32>}, {pipeline_mode = #tpu.pipeline_mode<synchronous>, transform_indices = @transform_1, window_bounds = array<i64: 1, 32>}, {pipeline_mode = #tpu.pipeline_mode<synchronous>, transform_indices = @transform_2, window_bounds = array<i64: 1, 32>}, {transform_indices = @transform_3, window_bounds = array<i64: 32, 96>}, {transform_indices = @transform_4, window_bounds = array<i64: 64, 96>}]} {
    %c0 = arith.constant 0 : index
    %c0_0 = arith.constant 0 : index
    %0 = vector.load %arg2[%c0, %c0_0] : memref<64x32xf32, #tpu.memory_space<vmem>>, vector<64x32xf32>
    %c0_1 = arith.constant 0 : index
    %c0_2 = arith.constant 0 : index
    %1 = vector.load %arg3[%c0_1, %c0_2] : memref<1x32xf32, #tpu.memory_space<vmem>>, vector<1x32xf32>
    %c0_3 = arith.constant 0 : index
    %c0_4 = arith.constant 0 : index
    %2 = vector.load %arg4[%c0_3, %c0_4] : memref<1x32xf32, #tpu.memory_space<vmem>>, vector<1x32xf32>
    %cst = arith.constant dense<0.000000e+00> : vector<64xf32>
    %3 = vector.multi_reduction <add>, %0, %cst [1] : vector<64x32xf32> to vector<64xf32>
    %4 = vector.shape_cast %3 : vector<64xf32> to vector<64x1xf32>
    %5 = arith.mulf %0, %0 : vector<64x32xf32>
    %cst_5 = arith.constant dense<0.000000e+00> : vector<64xf32>
    %6 = vector.multi_reduction <add>, %5, %cst_5 [1] : vector<64x32xf32> to vector<64xf32>
    %7 = vector.shape_cast %6 : vector<64xf32> to vector<64x1xf32>
    %cst_6 = arith.constant 3.125000e-02 : f32
    %8 = vector.broadcast %cst_6 : f32 to vector<64x1xf32>
    %9 = arith.mulf %4, %8 : vector<64x1xf32>
    %cst_7 = arith.constant 3.125000e-02 : f32
    %10 = vector.broadcast %cst_7 : f32 to vector<64x1xf32>
    %11 = arith.mulf %7, %10 : vector<64x1xf32>
    %12 = arith.mulf %9, %9 : vector<64x1xf32>
    %13 = arith.subf %11, %12 : vector<64x1xf32>
    %cst_8 = arith.constant 0.000000e+00 : f32
    %14 = vector.broadcast %cst_8 : f32 to vector<64x1xf32>
    %15 = arith.maximumf %13, %14 : vector<64x1xf32>
    %16 = vector.broadcast %9 : vector<64x1xf32> to vector<64x32xf32>
    %17 = arith.subf %0, %16 : vector<64x32xf32>
    %cst_9 = arith.constant 9.99999974E-6 : f32
    %18 = vector.broadcast %cst_9 : f32 to vector<64x1xf32>
    %19 = arith.addf %15, %18 : vector<64x1xf32>
    %20 = math.rsqrt %19 : vector<64x1xf32>
    %21 = vector.broadcast %20 : vector<64x1xf32> to vector<64x32xf32>
    %22 = arith.mulf %17, %21 : vector<64x32xf32>
    %23 = vector.broadcast %1 : vector<1x32xf32> to vector<64x32xf32>
    %24 = arith.mulf %22, %23 : vector<64x32xf32>
    %25 = vector.broadcast %2 : vector<1x32xf32> to vector<64x32xf32>
    %26 = arith.addf %24, %25 : vector<64x32xf32>
    %27 = arith.truncf %26 : vector<64x32xf32> to vector<64x32xbf16>
    %c0_10 = arith.constant 0 : index
    %c0_11 = arith.constant 0 : index
    %28 = vector.load %arg5[%c0_10, %c0_11] : memref<32x96xbf16, #tpu.memory_space<vmem>>, vector<32x96xbf16>
    %cst_12 = arith.constant dense<0.000000e+00> : vector<64x96xf32>
    %29 = tpu.matmul %27, %28, %cst_12 {dimension_numbers = #tpu.dot_dimension_numbers<[1], [0], [0], [1], [0, 0, 1, 1], [], []>} : vector<64x32xbf16>, vector<32x96xbf16>, vector<64x96xf32> -> vector<64x96xf32>
    %c0_13 = arith.constant 0 : index
    %c0_14 = arith.constant 0 : index
    %30 = vector.load %arg6[%c0_13, %c0_14] : memref<64x96xf32, #tpu.memory_space<vmem>>, vector<64x96xf32>
    tpu.vector_store %arg6[%c0_13, %c0_14], %29 {strides = array<i32>} : memref<64x96xf32, #tpu.memory_space<vmem>>, vector<64x96xf32>,
    return
  }
  func.func @transform_0(%arg0: i32, %arg1: i32) -> (i32, i32) {
    %c0_i32 = arith.constant 0 : i32
    %c0_i32_0 = arith.constant 0 : i32
    return %arg1, %c0_i32 : i32, i32
  }
  func.func @transform_1(%arg0: i32, %arg1: i32) -> (i32, i32) {
    %c0_i32 = arith.constant 0 : i32
    %c0_i32_0 = arith.constant 0 : i32
    %c0_i32_1 = arith.constant 0 : i32
    return %c0_i32, %c0_i32_0 : i32, i32
  }
  func.func @transform_2(%arg0: i32, %arg1: i32) -> (i32, i32) {
    %c0_i32 = arith.constant 0 : i32
    %c0_i32_0 = arith.constant 0 : i32
    %c0_i32_1 = arith.constant 0 : i32
    return %c0_i32, %c0_i32_0 : i32, i32
  }
  func.func @transform_3(%arg0: i32, %arg1: i32) -> (i32, i32) {
    %c0_i32 = arith.constant 0 : i32
    %c0_i32_0 = arith.constant 0 : i32
    return %c0_i32, %arg0 : i32, i32
  }
  func.func @transform_4(%arg0: i32, %arg1: i32) -> (i32, i32) {
    %c0_i32 = arith.constant 0 : i32
    return %arg1, %arg0 : i32, i32
  }
}

module attributes {stable_mosaic.version = 11 : i64} {
  func.func @_attention_kernel(%arg0: i32, %arg1: i32, %arg2: memref<1x8x32xf32, #tpu.memory_space<vmem>>, %arg3: memref<1x8x32xf32, #tpu.memory_space<vmem>>, %arg4: memref<1x8x32xf32, #tpu.memory_space<vmem>>, %arg5: memref<1x8x32xf32, #tpu.memory_space<vmem>>) attributes {dimension_semantics = [#tpu.dimension_semantics<parallel>, #tpu.dimension_semantics<parallel>], iteration_bounds = array<i64: 8, 1>, scalar_prefetch = 0 : i64, scratch_operands = 0 : i64, tpu.core_type = #tpu.core_type<tc>, window_params = [{transform_indices = @transform_0, window_bounds = array<i64: 1, 8, 32>}, {transform_indices = @transform_1, window_bounds = array<i64: 1, 8, 32>}, {transform_indices = @transform_2, window_bounds = array<i64: 1, 8, 32>}, {transform_indices = @transform_3, window_bounds = array<i64: 1, 8, 32>}]} {
    %c0 = arith.constant 0 : index
    %c0_0 = arith.constant 0 : index
    %c0_1 = arith.constant 0 : index
    %0 = vector.load %arg2[%c0, %c0_0, %c0_1] : memref<1x8x32xf32, #tpu.memory_space<vmem>>, vector<1x8x32xf32>
    %1 = vector.shape_cast %0 : vector<1x8x32xf32> to vector<8x32xf32>
    %2 = arith.truncf %1 : vector<8x32xf32> to vector<8x32xbf16>
    %c0_2 = arith.constant 0 : index
    %c0_3 = arith.constant 0 : index
    %c0_4 = arith.constant 0 : index
    %3 = vector.load %arg3[%c0_2, %c0_3, %c0_4] : memref<1x8x32xf32, #tpu.memory_space<vmem>>, vector<1x8x32xf32>
    %4 = vector.shape_cast %3 : vector<1x8x32xf32> to vector<8x32xf32>
    %5 = arith.truncf %4 : vector<8x32xf32> to vector<8x32xbf16>
    %c0_5 = arith.constant 0 : index
    %c0_6 = arith.constant 0 : index
    %c0_7 = arith.constant 0 : index
    %6 = vector.load %arg4[%c0_5, %c0_6, %c0_7] : memref<1x8x32xf32, #tpu.memory_space<vmem>>, vector<1x8x32xf32>
    %7 = vector.shape_cast %6 : vector<1x8x32xf32> to vector<8x32xf32>
    %8 = arith.truncf %7 : vector<8x32xf32> to vector<8x32xbf16>
    %cst = arith.constant dense<0.000000e+00> : vector<8x8xf32>
    %9 = tpu.matmul %2, %5, %cst {dimension_numbers = #tpu.dot_dimension_numbers<[1], [1], [0], [0], [0, 0, 1, 0], [], []>} : vector<8x32xbf16>, vector<8x32xbf16>, vector<8x8xf32> -> vector<8x8xf32>
    %cst_8 = arith.constant 0.176776692 : f32
    %10 = vector.broadcast %cst_8 : f32 to vector<8x8xf32>
    %11 = arith.mulf %9, %10 : vector<8x8xf32>
    %cst_9 = arith.constant dense<0xFF800000> : vector<8xf32>
    %12 = vector.multi_reduction <maximumf>, %11, %cst_9 [1] : vector<8x8xf32> to vector<8xf32>
    %13 = vector.shape_cast %12 : vector<8xf32> to vector<8x1xf32>
    %14 = vector.broadcast %13 : vector<8x1xf32> to vector<8x8xf32>
    %15 = arith.subf %11, %14 : vector<8x8xf32>
    %16 = math.exp %15 : vector<8x8xf32>
    %cst_10 = arith.constant dense<0.000000e+00> : vector<8xf32>
    %17 = vector.multi_reduction <add>, %16, %cst_10 [1] : vector<8x8xf32> to vector<8xf32>
    %18 = vector.shape_cast %17 : vector<8xf32> to vector<8x1xf32>
    %19 = tpu.reciprocal %18 {approx = true} : vector<8x1xf32> -> vector<8x1xf32>
    %20 = vector.broadcast %19 : vector<8x1xf32> to vector<8x8xf32>
    %21 = arith.mulf %16, %20 : vector<8x8xf32>
    %22 = arith.truncf %21 : vector<8x8xf32> to vector<8x8xbf16>
    %cst_11 = arith.constant dense<0.000000e+00> : vector<8x32xf32>
    %23 = tpu.matmul %22, %8, %cst_11 {dimension_numbers = #tpu.dot_dimension_numbers<[1], [0], [0], [1], [0, 0, 1, 1], [], []>} : vector<8x8xbf16>, vector<8x32xbf16>, vector<8x32xf32> -> vector<8x32xf32>
    %c0_12 = arith.constant 0 : index
    %c0_13 = arith.constant 0 : index
    %c0_14 = arith.constant 0 : index
    %24 = vector.load %arg5[%c0_12, %c0_13, %c0_14] : memref<1x8x32xf32, #tpu.memory_space<vmem>>, vector<1x8x32xf32>
    %25 = vector.shape_cast %24 : vector<1x8x32xf32> to vector<8x32xf32>
    %26 = vector.shape_cast %23 : vector<8x32xf32> to vector<1x8x32xf32>
    tpu.vector_store %arg5[%c0_12, %c0_13, %c0_14], %26 {strides = array<i32>} : memref<1x8x32xf32, #tpu.memory_space<vmem>>, vector<1x8x32xf32>,
    return
  }
  func.func @transform_0(%arg0: i32, %arg1: i32) -> (i32, i32, i32) {
    %c0_i32 = arith.constant 0 : i32
    %c0_i32_0 = arith.constant 0 : i32
    return %arg0, %arg1, %c0_i32 : i32, i32, i32
  }
  func.func @transform_1(%arg0: i32, %arg1: i32) -> (i32, i32, i32) {
    %c0_i32 = arith.constant 0 : i32
    %c0_i32_0 = arith.constant 0 : i32
    %c0_i32_1 = arith.constant 0 : i32
    return %arg0, %c0_i32, %c0_i32_0 : i32, i32, i32
  }
  func.func @transform_2(%arg0: i32, %arg1: i32) -> (i32, i32, i32) {
    %c0_i32 = arith.constant 0 : i32
    %c0_i32_0 = arith.constant 0 : i32
    %c0_i32_1 = arith.constant 0 : i32
    return %arg0, %c0_i32, %c0_i32_0 : i32, i32, i32
  }
  func.func @transform_3(%arg0: i32, %arg1: i32) -> (i32, i32, i32) {
    %c0_i32 = arith.constant 0 : i32
    %c0_i32_0 = arith.constant 0 : i32
    return %arg0, %arg1, %c0_i32 : i32, i32, i32
  }
}

module attributes {stable_mosaic.version = 11 : i64} {
  func.func @_matmul_bias_residual_kernel(%arg0: i32, %arg1: memref<64x32xf32, #tpu.memory_space<vmem>>, %arg2: memref<32x32xbf16, #tpu.memory_space<vmem>>, %arg3: memref<1x32xf32, #tpu.memory_space<vmem>>, %arg4: memref<64x32xf32, #tpu.memory_space<vmem>>, %arg5: memref<64x32xf32, #tpu.memory_space<vmem>>) attributes {dimension_semantics = [#tpu.dimension_semantics<parallel>], iteration_bounds = array<i64: 1>, scalar_prefetch = 0 : i64, scratch_operands = 0 : i64, tpu.core_type = #tpu.core_type<tc>, window_params = [{transform_indices = @transform_0, window_bounds = array<i64: 64, 32>}, {pipeline_mode = #tpu.pipeline_mode<synchronous>, transform_indices = @transform_1, window_bounds = array<i64: 32, 32>}, {pipeline_mode = #tpu.pipeline_mode<synchronous>, transform_indices = @transform_2, window_bounds = array<i64: 1, 32>}, {transform_indices = @transform_3, window_bounds = array<i64: 64, 32>}, {transform_indices = @transform_4, window_bounds = array<i64: 64, 32>}]} {
    %c0 = arith.constant 0 : index
    %c0_0 = arith.constant 0 : index
    %0 = vector.load %arg1[%c0, %c0_0] : memref<64x32xf32, #tpu.memory_space<vmem>>, vector<64x32xf32>
    %1 = arith.truncf %0 : vector<64x32xf32> to vector<64x32xbf16>
    %c0_1 = arith.constant 0 : index
    %c0_2 = arith.constant 0 : index
    %2 = vector.load %arg2[%c0_1, %c0_2] : memref<32x32xbf16, #tpu.memory_space<vmem>>, vector<32x32xbf16>
    %cst = arith.constant dense<0.000000e+00> : vector<64x32xf32>
    %3 = tpu.matmul %1, %2, %cst {dimension_numbers = #tpu.dot_dimension_numbers<[1], [0], [0], [1], [0, 0, 1, 1], [], []>} : vector<64x32xbf16>, vector<32x32xbf16>, vector<64x32xf32> -> vector<64x32xf32>
    %c0_3 = arith.constant 0 : index
    %c0_4 = arith.constant 0 : index
    %4 = vector.load %arg3[%c0_3, %c0_4] : memref<1x32xf32, #tpu.memory_space<vmem>>, vector<1x32xf32>
    %5 = vector.broadcast %4 : vector<1x32xf32> to vector<64x32xf32>
    %6 = arith.addf %3, %5 : vector<64x32xf32>
    %c0_5 = arith.constant 0 : index
    %c0_6 = arith.constant 0 : index
    %7 = vector.load %arg4[%c0_5, %c0_6] : memref<64x32xf32, #tpu.memory_space<vmem>>, vector<64x32xf32>
    %8 = arith.addf %6, %7 : vector<64x32xf32>
    %c0_7 = arith.constant 0 : index
    %c0_8 = arith.constant 0 : index
    %9 = vector.load %arg5[%c0_7, %c0_8] : memref<64x32xf32, #tpu.memory_space<vmem>>, vector<64x32xf32>
    tpu.vector_store %arg5[%c0_7, %c0_8], %8 {strides = array<i32>} : memref<64x32xf32, #tpu.memory_space<vmem>>, vector<64x32xf32>,
    return
  }
  func.func @transform_0(%arg0: i32) -> (i32, i32) {
    %c0_i32 = arith.constant 0 : i32
    %c0_i32_0 = arith.constant 0 : i32
    return %arg0, %c0_i32 : i32, i32
  }
  func.func @transform_1(%arg0: i32) -> (i32, i32) {
    %c0_i32 = arith.constant 0 : i32
    %c0_i32_0 = arith.constant 0 : i32
    %c0_i32_1 = arith.constant 0 : i32
    return %c0_i32, %c0_i32_0 : i32, i32
  }
  func.func @transform_2(%arg0: i32) -> (i32, i32) {
    %c0_i32 = arith.constant 0 : i32
    %c0_i32_0 = arith.constant 0 : i32
    %c0_i32_1 = arith.constant 0 : i32
    return %c0_i32, %c0_i32_0 : i32, i32
  }
  func.func @transform_3(%arg0: i32) -> (i32, i32) {
    %c0_i32 = arith.constant 0 : i32
    %c0_i32_0 = arith.constant 0 : i32
    return %arg0, %c0_i32 : i32, i32
  }
  func.func @transform_4(%arg0: i32) -> (i32, i32) {
    %c0_i32 = arith.constant 0 : i32
    %c0_i32_0 = arith.constant 0 : i32
    return %arg0, %c0_i32 : i32, i32
  }
}

module attributes {stable_mosaic.version = 11 : i64} {
  func.func @_prenorm_ffn_residual_kernel(%arg0: i32, %arg1: memref<64x32xf32, #tpu.memory_space<vmem>>, %arg2: memref<1x32xf32, #tpu.memory_space<vmem>>, %arg3: memref<1x32xf32, #tpu.memory_space<vmem>>, %arg4: memref<32x64xbf16, #tpu.memory_space<vmem>>, %arg5: memref<1x64xf32, #tpu.memory_space<vmem>>, %arg6: memref<64x32xbf16, #tpu.memory_space<vmem>>, %arg7: memref<1x32xf32, #tpu.memory_space<vmem>>, %arg8: memref<64x32xf32, #tpu.memory_space<vmem>>) attributes {dimension_semantics = [#tpu.dimension_semantics<parallel>], iteration_bounds = array<i64: 1>, scalar_prefetch = 0 : i64, scratch_operands = 0 : i64, tpu.core_type = #tpu.core_type<tc>, window_params = [{transform_indices = @transform_0, window_bounds = array<i64: 64, 32>}, {pipeline_mode = #tpu.pipeline_mode<synchronous>, transform_indices = @transform_1, window_bounds = array<i64: 1, 32>}, {pipeline_mode = #tpu.pipeline_mode<synchronous>, transform_indices = @transform_2, window_bounds = array<i64: 1, 32>}, {pipeline_mode = #tpu.pipeline_mode<synchronous>, transform_indices = @transform_3, window_bounds = array<i64: 32, 64>}, {pipeline_mode = #tpu.pipeline_mode<synchronous>, transform_indices = @transform_4, window_bounds = array<i64: 1, 64>}, {pipeline_mode = #tpu.pipeline_mode<synchronous>, transform_indices = @transform_5, window_bounds = array<i64: 64, 32>}, {pipeline_mode = #tpu.pipeline_mode<synchronous>, transform_indices = @transform_6, window_bounds = array<i64: 1, 32>}, {transform_indices = @transform_7, window_bounds = array<i64: 64, 32>}]} {
    %c0 = arith.constant 0 : index
    %c0_0 = arith.constant 0 : index
    %0 = vector.load %arg1[%c0, %c0_0] : memref<64x32xf32, #tpu.memory_space<vmem>>, vector<64x32xf32>
    %c0_1 = arith.constant 0 : index
    %c0_2 = arith.constant 0 : index
    %1 = vector.load %arg2[%c0_1, %c0_2] : memref<1x32xf32, #tpu.memory_space<vmem>>, vector<1x32xf32>
    %c0_3 = arith.constant 0 : index
    %c0_4 = arith.constant 0 : index
    %2 = vector.load %arg3[%c0_3, %c0_4] : memref<1x32xf32, #tpu.memory_space<vmem>>, vector<1x32xf32>
    %cst = arith.constant dense<0.000000e+00> : vector<64xf32>
    %3 = vector.multi_reduction <add>, %0, %cst [1] : vector<64x32xf32> to vector<64xf32>
    %4 = vector.shape_cast %3 : vector<64xf32> to vector<64x1xf32>
    %5 = arith.mulf %0, %0 : vector<64x32xf32>
    %cst_5 = arith.constant dense<0.000000e+00> : vector<64xf32>
    %6 = vector.multi_reduction <add>, %5, %cst_5 [1] : vector<64x32xf32> to vector<64xf32>
    %7 = vector.shape_cast %6 : vector<64xf32> to vector<64x1xf32>
    %cst_6 = arith.constant 3.125000e-02 : f32
    %8 = vector.broadcast %cst_6 : f32 to vector<64x1xf32>
    %9 = arith.mulf %4, %8 : vector<64x1xf32>
    %cst_7 = arith.constant 3.125000e-02 : f32
    %10 = vector.broadcast %cst_7 : f32 to vector<64x1xf32>
    %11 = arith.mulf %7, %10 : vector<64x1xf32>
    %12 = arith.mulf %9, %9 : vector<64x1xf32>
    %13 = arith.subf %11, %12 : vector<64x1xf32>
    %cst_8 = arith.constant 0.000000e+00 : f32
    %14 = vector.broadcast %cst_8 : f32 to vector<64x1xf32>
    %15 = arith.maximumf %13, %14 : vector<64x1xf32>
    %16 = vector.broadcast %9 : vector<64x1xf32> to vector<64x32xf32>
    %17 = arith.subf %0, %16 : vector<64x32xf32>
    %cst_9 = arith.constant 9.99999974E-6 : f32
    %18 = vector.broadcast %cst_9 : f32 to vector<64x1xf32>
    %19 = arith.addf %15, %18 : vector<64x1xf32>
    %20 = math.rsqrt %19 : vector<64x1xf32>
    %21 = vector.broadcast %20 : vector<64x1xf32> to vector<64x32xf32>
    %22 = arith.mulf %17, %21 : vector<64x32xf32>
    %23 = vector.broadcast %1 : vector<1x32xf32> to vector<64x32xf32>
    %24 = arith.mulf %22, %23 : vector<64x32xf32>
    %25 = vector.broadcast %2 : vector<1x32xf32> to vector<64x32xf32>
    %26 = arith.addf %24, %25 : vector<64x32xf32>
    %27 = arith.truncf %26 : vector<64x32xf32> to vector<64x32xbf16>
    %c0_10 = arith.constant 0 : index
    %c0_11 = arith.constant 0 : index
    %28 = vector.load %arg4[%c0_10, %c0_11] : memref<32x64xbf16, #tpu.memory_space<vmem>>, vector<32x64xbf16>
    %cst_12 = arith.constant dense<0.000000e+00> : vector<64x64xf32>
    %29 = tpu.matmul %27, %28, %cst_12 {dimension_numbers = #tpu.dot_dimension_numbers<[1], [0], [0], [1], [0, 0, 1, 1], [], []>} : vector<64x32xbf16>, vector<32x64xbf16>, vector<64x64xf32> -> vector<64x64xf32>
    %c0_13 = arith.constant 0 : index
    %c0_14 = arith.constant 0 : index
    %30 = vector.load %arg5[%c0_13, %c0_14] : memref<1x64xf32, #tpu.memory_space<vmem>>, vector<1x64xf32>
    %31 = vector.broadcast %30 : vector<1x64xf32> to vector<64x64xf32>
    %32 = arith.addf %29, %31 : vector<64x64xf32>
    %cst_15 = arith.constant 0.000000e+00 : f32
    %33 = vector.broadcast %cst_15 : f32 to vector<64x64xf32>
    %34 = arith.subf %33, %32 : vector<64x64xf32>
    %35 = math.exp %34 : vector<64x64xf32>
    %cst_16 = arith.constant 1.000000e+00 : f32
    %36 = vector.broadcast %cst_16 : f32 to vector<64x64xf32>
    %37 = arith.addf %36, %35 : vector<64x64xf32>
    %cst_17 = arith.constant 1.000000e+00 : f32
    %38 = vector.broadcast %cst_17 : f32 to vector<64x64xf32>
    %39 = arith.divf %38, %37 : vector<64x64xf32>
    %40 = arith.mulf %32, %39 : vector<64x64xf32>
    %41 = arith.truncf %40 : vector<64x64xf32> to vector<64x64xbf16>
    %c0_18 = arith.constant 0 : index
    %c0_19 = arith.constant 0 : index
    %42 = vector.load %arg6[%c0_18, %c0_19] : memref<64x32xbf16, #tpu.memory_space<vmem>>, vector<64x32xbf16>
    %cst_20 = arith.constant dense<0.000000e+00> : vector<64x32xf32>
    %43 = tpu.matmul %41, %42, %cst_20 {dimension_numbers = #tpu.dot_dimension_numbers<[1], [0], [0], [1], [0, 0, 1, 1], [], []>} : vector<64x64xbf16>, vector<64x32xbf16>, vector<64x32xf32> -> vector<64x32xf32>
    %c0_21 = arith.constant 0 : index
    %c0_22 = arith.constant 0 : index
    %44 = vector.load %arg7[%c0_21, %c0_22] : memref<1x32xf32, #tpu.memory_space<vmem>>, vector<1x32xf32>
    %45 = vector.broadcast %44 : vector<1x32xf32> to vector<64x32xf32>
    %46 = arith.addf %43, %45 : vector<64x32xf32>
    %47 = arith.addf %46, %0 : vector<64x32xf32>
    %c0_23 = arith.constant 0 : index
    %c0_24 = arith.constant 0 : index
    %48 = vector.load %arg8[%c0_23, %c0_24] : memref<64x32xf32, #tpu.memory_space<vmem>>, vector<64x32xf32>
    tpu.vector_store %arg8[%c0_23, %c0_24], %47 {strides = array<i32>} : memref<64x32xf32, #tpu.memory_space<vmem>>, vector<64x32xf32>,
    return
  }
  func.func @transform_0(%arg0: i32) -> (i32, i32) {
    %c0_i32 = arith.constant 0 : i32
    %c0_i32_0 = arith.constant 0 : i32
    return %arg0, %c0_i32 : i32, i32
  }
  func.func @transform_1(%arg0: i32) -> (i32, i32) {
    %c0_i32 = arith.constant 0 : i32
    %c0_i32_0 = arith.constant 0 : i32
    %c0_i32_1 = arith.constant 0 : i32
    return %c0_i32, %c0_i32_0 : i32, i32
  }
  func.func @transform_2(%arg0: i32) -> (i32, i32) {
    %c0_i32 = arith.constant 0 : i32
    %c0_i32_0 = arith.constant 0 : i32
    %c0_i32_1 = arith.constant 0 : i32
    return %c0_i32, %c0_i32_0 : i32, i32
  }
  func.func @transform_3(%arg0: i32) -> (i32, i32) {
    %c0_i32 = arith.constant 0 : i32
    %c0_i32_0 = arith.constant 0 : i32
    %c0_i32_1 = arith.constant 0 : i32
    return %c0_i32, %c0_i32_0 : i32, i32
  }
  func.func @transform_4(%arg0: i32) -> (i32, i32) {
    %c0_i32 = arith.constant 0 : i32
    %c0_i32_0 = arith.constant 0 : i32
    %c0_i32_1 = arith.constant 0 : i32
    return %c0_i32, %c0_i32_0 : i32, i32
  }
  func.func @transform_5(%arg0: i32) -> (i32, i32) {
    %c0_i32 = arith.constant 0 : i32
    %c0_i32_0 = arith.constant 0 : i32
    %c0_i32_1 = arith.constant 0 : i32
    return %c0_i32, %c0_i32_0 : i32, i32
  }
  func.func @transform_6(%arg0: i32) -> (i32, i32) {
    %c0_i32 = arith.constant 0 : i32
    %c0_i32_0 = arith.constant 0 : i32
    %c0_i32_1 = arith.constant 0 : i32
    return %c0_i32, %c0_i32_0 : i32, i32
  }
  func.func @transform_7(%arg0: i32) -> (i32, i32) {
    %c0_i32 = arith.constant 0 : i32
    %c0_i32_0 = arith.constant 0 : i32
    return %arg0, %c0_i32 : i32, i32
  }
}

module attributes {stable_mosaic.version = 11 : i64} {
  func.func @_prenorm_ffn_residual_kernel(%arg0: i32, %arg1: memref<64x32xf32, #tpu.memory_space<vmem>>, %arg2: memref<1x32xf32, #tpu.memory_space<vmem>>, %arg3: memref<1x32xf32, #tpu.memory_space<vmem>>, %arg4: memref<32x64xbf16, #tpu.memory_space<vmem>>, %arg5: memref<1x64xf32, #tpu.memory_space<vmem>>, %arg6: memref<64x32xbf16, #tpu.memory_space<vmem>>, %arg7: memref<1x32xf32, #tpu.memory_space<vmem>>, %arg8: memref<64x32xf32, #tpu.memory_space<vmem>>) attributes {dimension_semantics = [#tpu.dimension_semantics<parallel>], iteration_bounds = array<i64: 1>, scalar_prefetch = 0 : i64, scratch_operands = 0 : i64, tpu.core_type = #tpu.core_type<tc>, window_params = [{transform_indices = @transform_0, window_bounds = array<i64: 64, 32>}, {pipeline_mode = #tpu.pipeline_mode<synchronous>, transform_indices = @transform_1, window_bounds = array<i64: 1, 32>}, {pipeline_mode = #tpu.pipeline_mode<synchronous>, transform_indices = @transform_2, window_bounds = array<i64: 1, 32>}, {pipeline_mode = #tpu.pipeline_mode<synchronous>, transform_indices = @transform_3, window_bounds = array<i64: 32, 64>}, {pipeline_mode = #tpu.pipeline_mode<synchronous>, transform_indices = @transform_4, window_bounds = array<i64: 1, 64>}, {pipeline_mode = #tpu.pipeline_mode<synchronous>, transform_indices = @transform_5, window_bounds = array<i64: 64, 32>}, {pipeline_mode = #tpu.pipeline_mode<synchronous>, transform_indices = @transform_6, window_bounds = array<i64: 1, 32>}, {transform_indices = @transform_7, window_bounds = array<i64: 64, 32>}]} {
    %c0 = arith.constant 0 : index
    %c0_0 = arith.constant 0 : index
    %0 = vector.load %arg1[%c0, %c0_0] : memref<64x32xf32, #tpu.memory_space<vmem>>, vector<64x32xf32>
    %c0_1 = arith.constant 0 : index
    %c0_2 = arith.constant 0 : index
    %1 = vector.load %arg2[%c0_1, %c0_2] : memref<1x32xf32, #tpu.memory_space<vmem>>, vector<1x32xf32>
    %c0_3 = arith.constant 0 : index
    %c0_4 = arith.constant 0 : index
    %2 = vector.load %arg3[%c0_3, %c0_4] : memref<1x32xf32, #tpu.memory_space<vmem>>, vector<1x32xf32>
    %cst = arith.constant dense<0.000000e+00> : vector<64xf32>
    %3 = vector.multi_reduction <add>, %0, %cst [1] : vector<64x32xf32> to vector<64xf32>
    %4 = vector.shape_cast %3 : vector<64xf32> to vector<64x1xf32>
    %5 = arith.mulf %0, %0 : vector<64x32xf32>
    %cst_5 = arith.constant dense<0.000000e+00> : vector<64xf32>
    %6 = vector.multi_reduction <add>, %5, %cst_5 [1] : vector<64x32xf32> to vector<64xf32>
    %7 = vector.shape_cast %6 : vector<64xf32> to vector<64x1xf32>
    %cst_6 = arith.constant 3.125000e-02 : f32
    %8 = vector.broadcast %cst_6 : f32 to vector<64x1xf32>
    %9 = arith.mulf %4, %8 : vector<64x1xf32>
    %cst_7 = arith.constant 3.125000e-02 : f32
    %10 = vector.broadcast %cst_7 : f32 to vector<64x1xf32>
    %11 = arith.mulf %7, %10 : vector<64x1xf32>
    %12 = arith.mulf %9, %9 : vector<64x1xf32>
    %13 = arith.subf %11, %12 : vector<64x1xf32>
    %cst_8 = arith.constant 0.000000e+00 : f32
    %14 = vector.broadcast %cst_8 : f32 to vector<64x1xf32>
    %15 = arith.maximumf %13, %14 : vector<64x1xf32>
    %16 = vector.broadcast %9 : vector<64x1xf32> to vector<64x32xf32>
    %17 = arith.subf %0, %16 : vector<64x32xf32>
    %cst_9 = arith.constant 9.99999974E-6 : f32
    %18 = vector.broadcast %cst_9 : f32 to vector<64x1xf32>
    %19 = arith.addf %15, %18 : vector<64x1xf32>
    %20 = math.rsqrt %19 : vector<64x1xf32>
    %21 = vector.broadcast %20 : vector<64x1xf32> to vector<64x32xf32>
    %22 = arith.mulf %17, %21 : vector<64x32xf32>
    %23 = vector.broadcast %1 : vector<1x32xf32> to vector<64x32xf32>
    %24 = arith.mulf %22, %23 : vector<64x32xf32>
    %25 = vector.broadcast %2 : vector<1x32xf32> to vector<64x32xf32>
    %26 = arith.addf %24, %25 : vector<64x32xf32>
    %27 = arith.truncf %26 : vector<64x32xf32> to vector<64x32xbf16>
    %c0_10 = arith.constant 0 : index
    %c0_11 = arith.constant 0 : index
    %28 = vector.load %arg4[%c0_10, %c0_11] : memref<32x64xbf16, #tpu.memory_space<vmem>>, vector<32x64xbf16>
    %cst_12 = arith.constant dense<0.000000e+00> : vector<64x64xf32>
    %29 = tpu.matmul %27, %28, %cst_12 {dimension_numbers = #tpu.dot_dimension_numbers<[1], [0], [0], [1], [0, 0, 1, 1], [], []>} : vector<64x32xbf16>, vector<32x64xbf16>, vector<64x64xf32> -> vector<64x64xf32>
    %c0_13 = arith.constant 0 : index
    %c0_14 = arith.constant 0 : index
    %30 = vector.load %arg5[%c0_13, %c0_14] : memref<1x64xf32, #tpu.memory_space<vmem>>, vector<1x64xf32>
    %31 = vector.broadcast %30 : vector<1x64xf32> to vector<64x64xf32>
    %32 = arith.addf %29, %31 : vector<64x64xf32>
    %cst_15 = arith.constant 0.000000e+00 : f32
    %33 = vector.broadcast %cst_15 : f32 to vector<64x64xf32>
    %34 = arith.subf %33, %32 : vector<64x64xf32>
    %35 = math.exp %34 : vector<64x64xf32>
    %cst_16 = arith.constant 1.000000e+00 : f32
    %36 = vector.broadcast %cst_16 : f32 to vector<64x64xf32>
    %37 = arith.addf %36, %35 : vector<64x64xf32>
    %cst_17 = arith.constant 1.000000e+00 : f32
    %38 = vector.broadcast %cst_17 : f32 to vector<64x64xf32>
    %39 = arith.divf %38, %37 : vector<64x64xf32>
    %40 = arith.mulf %32, %39 : vector<64x64xf32>
    %41 = arith.truncf %40 : vector<64x64xf32> to vector<64x64xbf16>
    %c0_18 = arith.constant 0 : index
    %c0_19 = arith.constant 0 : index
    %42 = vector.load %arg6[%c0_18, %c0_19] : memref<64x32xbf16, #tpu.memory_space<vmem>>, vector<64x32xbf16>
    %cst_20 = arith.constant dense<0.000000e+00> : vector<64x32xf32>
    %43 = tpu.matmul %41, %42, %cst_20 {dimension_numbers = #tpu.dot_dimension_numbers<[1], [0], [0], [1], [0, 0, 1, 1], [], []>} : vector<64x64xbf16>, vector<64x32xbf16>, vector<64x32xf32> -> vector<64x32xf32>
    %c0_21 = arith.constant 0 : index
    %c0_22 = arith.constant 0 : index
    %44 = vector.load %arg7[%c0_21, %c0_22] : memref<1x32xf32, #tpu.memory_space<vmem>>, vector<1x32xf32>
    %45 = vector.broadcast %44 : vector<1x32xf32> to vector<64x32xf32>
    %46 = arith.addf %43, %45 : vector<64x32xf32>
    %47 = arith.addf %46, %0 : vector<64x32xf32>
    %c0_23 = arith.constant 0 : index
    %c0_24 = arith.constant 0 : index
    %48 = vector.load %arg8[%c0_23, %c0_24] : memref<64x32xf32, #tpu.memory_space<vmem>>, vector<64x32xf32>
    tpu.vector_store %arg8[%c0_23, %c0_24], %47 {strides = array<i32>} : memref<64x32xf32, #tpu.memory_space<vmem>>, vector<64x32xf32>,
    return
  }
  func.func @transform_0(%arg0: i32) -> (i32, i32) {
    %c0_i32 = arith.constant 0 : i32
    %c0_i32_0 = arith.constant 0 : i32
    return %arg0, %c0_i32 : i32, i32
  }
  func.func @transform_1(%arg0: i32) -> (i32, i32) {
    %c0_i32 = arith.constant 0 : i32
    %c0_i32_0 = arith.constant 0 : i32
    %c0_i32_1 = arith.constant 0 : i32
    return %c0_i32, %c0_i32_0 : i32, i32
  }
  func.func @transform_2(%arg0: i32) -> (i32, i32) {
    %c0_i32 = arith.constant 0 : i32
    %c0_i32_0 = arith.constant 0 : i32
    %c0_i32_1 = arith.constant 0 : i32
    return %c0_i32, %c0_i32_0 : i32, i32
  }
  func.func @transform_3(%arg0: i32) -> (i32, i32) {
    %c0_i32 = arith.constant 0 : i32
    %c0_i32_0 = arith.constant 0 : i32
    %c0_i32_1 = arith.constant 0 : i32
    return %c0_i32, %c0_i32_0 : i32, i32
  }
  func.func @transform_4(%arg0: i32) -> (i32, i32) {
    %c0_i32 = arith.constant 0 : i32
    %c0_i32_0 = arith.constant 0 : i32
    %c0_i32_1 = arith.constant 0 : i32
    return %c0_i32, %c0_i32_0 : i32, i32
  }
  func.func @transform_5(%arg0: i32) -> (i32, i32) {
    %c0_i32 = arith.constant 0 : i32
    %c0_i32_0 = arith.constant 0 : i32
    %c0_i32_1 = arith.constant 0 : i32
    return %c0_i32, %c0_i32_0 : i32, i32
  }
  func.func @transform_6(%arg0: i32) -> (i32, i32) {
    %c0_i32 = arith.constant 0 : i32
    %c0_i32_0 = arith.constant 0 : i32
    %c0_i32_1 = arith.constant 0 : i32
    return %c0_i32, %c0_i32_0 : i32, i32
  }
  func.func @transform_7(%arg0: i32) -> (i32, i32) {
    %c0_i32 = arith.constant 0 : i32
    %c0_i32_0 = arith.constant 0 : i32
    return %arg0, %c0_i32 : i32, i32
  }
}

</mosaic_0001>

<bundles_post_ra>
// kernel: squeeze.6
= control target key start
LH: loop header
LB: loop body
LE: loop exit
PB: predicated region body
PF: predicated region fallthrough
CT: control target
= control target key end

     0   :  { %vm323_vm0 = vcmask 1047556   ;;  %s807_s10 = smov 24   ;;  %vm325_vm1 = vcmask 64512   ;;  %s809_s28 = smov 8   ;;  %vm398_vm2 = vcmask 261312   ;;  %vm485_vm3 = vcmask 195712   ;;  %s1196_s0 = inlined_call_operand.vmem [shape: f32[1,2,4,8,4,8], index: 0, kind: input, shape index: {}]   ;;  %s1197_s1 = inlined_call_operand.vmem [shape: f32[8,8,32], index: 1, kind: output, shape index: {}]  }
   0x1   :  { %v769_v0 = vld [vmem:[%s1196_s0 + $0x1c] sm:$0xf]  ;;  %v770_v1 = vld [vmem:[%s1196_s0 + $0x18] sm:$0xf]  ;;  %v771_v2 = vld [vmem:[%s1196_s0 + $0x14] sm:$0xf] }
   0x2   :  { %289 = vst [vmem:[#allocation0 + $0x38] sm:$0xf] %v769_v0  ;;  %294 = vst [vmem:[#allocation0 + $0x30] sm:$0xf] %v770_v1  ;;  %v772_v3 = vld [vmem:[%s1196_s0 + $0x10] sm:$0xf] }
   0x3   :  { %299 = vst [vmem:[#allocation0 + $0x28] sm:$0xf] %v771_v2  ;;  %v773_v4 = vld [vmem:[%s1196_s0 + $0xc] sm:$0xf]  ;;  %v774_v5 = vld [vmem:[%s1196_s0 + $0x8] sm:$0xf] }
   0x4   :  { %304 = vst [vmem:[#allocation0 + $0x20] sm:$0xf] %v772_v3  ;;  %309 = vst [vmem:[#allocation0 + $0x18] sm:$0xf] %v773_v4  ;;  %v775_v6 = vld [vmem:[%s1196_s0 + $0x4] sm:$0xf] }
   0x5   :  { %314 = vst [vmem:[#allocation0 + $0x10] sm:$0xf] %v774_v5  ;;  %v319_v7 = vld [vmem:[%s1196_s0] sm:$0xf]  ;;  %318 = vst [vmem:[#allocation0 + $0x8] sm:$0xf] %v775_v6 }
   0x6   :  { %320 = vst [vmem:[#allocation0] sm:$0xf] %v319_v7  ;;  %v761_v8 = vld [vmem:[%s1196_s0 + $0x3c] sm:$0xf]  ;;  %v762_v9 = vld [vmem:[%s1196_s0 + $0x38] sm:$0xf] }
   0x7   :  { %v763_v10 = vld [vmem:[%s1196_s0 + $0x34] sm:$0xf]  ;;  %249 = vst [vmem:[#allocation0 + $0x78] sm:$0xf] %v761_v8  ;;  %254 = vst [vmem:[#allocation0 + $0x70] sm:$0xf] %v762_v9 }
   0x8   :  { %259 = vst [vmem:[#allocation0 + $0x68] sm:$0xf] %v763_v10  ;;  %v764_v11 = vld [vmem:[%s1196_s0 + $0x30] sm:$0xf]  ;;  %v765_v12 = vld [vmem:[%s1196_s0 + $0x2c] sm:$0xf] }
   0x9   :  { %v766_v13 = vld [vmem:[%s1196_s0 + $0x28] sm:$0xf]  ;;  %264 = vst [vmem:[#allocation0 + $0x60] sm:$0xf] %v764_v11  ;;  %269 = vst [vmem:[#allocation0 + $0x58] sm:$0xf] %v765_v12 }
   0xa   :  { %274 = vst [vmem:[#allocation0 + $0x50] sm:$0xf] %v766_v13  ;;  %v767_v14 = vld [vmem:[%s1196_s0 + $0x24] sm:$0xf]  ;;  %v768_v15 = vld [vmem:[%s1196_s0 + $0x20] sm:$0xf] }
   0xb   :  { %v737_v16 = vld [vmem:[%s1196_s0 + $0x9c] sm:$0xf]  ;;  %279 = vst [vmem:[#allocation0 + $0x48] sm:$0xf] %v767_v14  ;;  %284 = vst [vmem:[#allocation0 + $0x40] sm:$0xf] %v768_v15 }
   0xc   :  { %129 = vst [vmem:[#allocation0 + $0x138] sm:$0xf] %v737_v16  ;;  %v738_v17 = vld [vmem:[%s1196_s0 + $0x98] sm:$0xf]  ;;  %v739_v18 = vld [vmem:[%s1196_s0 + $0x94] sm:$0xf] }
   0xd   :  { %v740_v19 = vld [vmem:[%s1196_s0 + $0x90] sm:$0xf]  ;;  %134 = vst [vmem:[#allocation0 + $0x130] sm:$0xf] %v738_v17  ;;  %139 = vst [vmem:[#allocation0 + $0x128] sm:$0xf] %v739_v18 }
   0xe   :  { %144 = vst [vmem:[#allocation0 + $0x120] sm:$0xf] %v740_v19  ;;  %v741_v20 = vld [vmem:[%s1196_s0 + $0x8c] sm:$0xf]  ;;  %v742_v21 = vld [vmem:[%s1196_s0 + $0x88] sm:$0xf] }
   0xf   :  { %v743_v22 = vld [vmem:[%s1196_s0 + $0x84] sm:$0xf]  ;;  %149 = vst [vmem:[#allocation0 + $0x118] sm:$0xf] %v741_v20  ;;  %154 = vst [vmem:[#allocation0 + $0x110] sm:$0xf] %v742_v21 }
  0x10   :  { %159 = vst [vmem:[#allocation0 + $0x108] sm:$0xf] %v743_v22  ;;  %v744_v23 = vld [vmem:[%s1196_s0 + $0x80] sm:$0xf]  ;;  %v729_v24 = vld [vmem:[%s1196_s0 + $0xbc] sm:$0xf] }
  0x11   :  { %v730_v25 = vld [vmem:[%s1196_s0 + $0xb8] sm:$0xf]  ;;  %164 = vst [vmem:[#allocation0 + $0x100] sm:$0xf] %v744_v23  ;;  %89 = vst [vmem:[#allocation0 + $0x178] sm:$0xf] %v729_v24 }
  0x12   :  { %v393_v26 = vld [vmem:[#allocation0 + $0x3] ss:$8 sm:$0xf0]   ;;  %94 = vst [vmem:[#allocation0 + $0x170] sm:$0xf] %v730_v25  ;;  %vm572_vm4 = vcmask 130112  }
  0x13   :  { %v731_v27 = vld [vmem:[%s1196_s0 + $0xb4] sm:$0xf]  ;;  %v391_v28 = vld [vmem:[#allocation0 + $0x3] ss:$8 sm:$0xf]  }
  0x14   :  { %99 = vst [vmem:[#allocation0 + $0x168] sm:$0xf] %v731_v27  ;;  %v732_v29 = vld [vmem:[%s1196_s0 + $0xb0] sm:$0xf]  ;;  %v395_v30 = vsel %vm323_vm0, %v393_v26, %v391_v28  ;;  %v733_v31 = vld [vmem:[%s1196_s0 + $0xac] sm:$0xf] }
  0x15   :  { %104 = vst [vmem:[#allocation0 + $0x160] sm:$0xf] %v732_v29  ;;  %v734_v32 = vld [vmem:[%s1196_s0 + $0xa8] sm:$0xf]  ;;  %v735_v33 = vld [vmem:[%s1196_s0 + $0xa4] sm:$0xf]  ;;  %396 = vrot.lane.b32.xlu0 %v395_v30, %s807_s10 }
  0x16   :  { %v414_v34 = vld [vmem:[#allocation0 + $0x43] ss:$8 sm:$0xf0]   ;;  %109 = vst [vmem:[#allocation0 + $0x158] sm:$0xf] %v733_v31 }
  0x17   :  { %114 = vst [vmem:[#allocation0 + $0x150] sm:$0xf] %v734_v32  ;;  %119 = vst [vmem:[#allocation0 + $0x148] sm:$0xf] %v735_v33  ;;  %v736_v35 = vld [vmem:[%s1196_s0 + $0xa0] sm:$0xf] }
  0x18   :  { %v412_v36 = vld [vmem:[#allocation0 + $0x43] ss:$8 sm:$0xf]   ;;  %124 = vst [vmem:[#allocation0 + $0x140] sm:$0xf] %v736_v35 }
  0x19   :  { %v753_v37 = vld [vmem:[%s1196_s0 + $0x5c] sm:$0xf]  ;;  %v416_v38 = vsel %vm323_vm0, %v414_v34, %v412_v36  ;;  %v403_v39 = vld [vmem:[#allocation0 + $0x103] ss:$8 sm:$0xf0]  }
  0x1a   :  { %209 = vst [vmem:[#allocation0 + $0xb8] sm:$0xf] %v753_v37  ;;  %v754_v40 = vld [vmem:[%s1196_s0 + $0x58] sm:$0xf]  ;;  %417 = vrot.lane.b32.xlu1 %v416_v38, %s807_s10  ;;  %v755_v41 = vld [vmem:[%s1196_s0 + $0x54] sm:$0xf] }
  0x1b   :  { %214 = vst [vmem:[#allocation0 + $0xb0] sm:$0xf] %v754_v40  ;;  %v756_v42 = vld [vmem:[%s1196_s0 + $0x50] sm:$0xf]  ;;  %v757_v43 = vld [vmem:[%s1196_s0 + $0x4c] sm:$0xf] }
  0x1c   :  { %v401_v44 = vld [vmem:[#allocation0 + $0x103] ss:$8 sm:$0xf]   ;;  %219 = vst [vmem:[#allocation0 + $0xa8] sm:$0xf] %v755_v41 }
  0x1d   :  { %224 = vst [vmem:[#allocation0 + $0xa0] sm:$0xf] %v756_v42  ;;  %229 = vst [vmem:[#allocation0 + $0x98] sm:$0xf] %v757_v43  ;;  %v758_v45 = vld [vmem:[%s1196_s0 + $0x48] sm:$0xf]  ;;  %v405_v46 = vsel %vm323_vm0, %v403_v39, %v401_v44 }
  0x1e   :  { %234 = vst [vmem:[#allocation0 + $0x90] sm:$0xf] %v758_v45  ;;  %v759_v47 = vld [vmem:[%s1196_s0 + $0x44] sm:$0xf]  ;;  %v760_v48 = vld [vmem:[%s1196_s0 + $0x40] sm:$0xf]  ;;  %406 = vrot.lane.b32.xlu0 %v405_v46, %s807_s10 }
  0x1f   :  { %v721_v49 = vld [vmem:[%s1196_s0 + $0xdc] sm:$0xf]  ;;  %v425_v50 = vld [vmem:[#allocation0 + $0x143] ss:$8 sm:$0xf0]  }
  0x20   :  { %239 = vst [vmem:[#allocation0 + $0x88] sm:$0xf] %v759_v47  ;;  %244 = vst [vmem:[#allocation0 + $0x80] sm:$0xf] %v760_v48  ;;  %v722_v51 = vld [vmem:[%s1196_s0 + $0xd8] sm:$0xf] }
  0x21   :  { %49 = vst [vmem:[#allocation0 + $0x1b8] sm:$0xf] %v721_v49  ;;  %54 = vst [vmem:[#allocation0 + $0x1b0] sm:$0xf] %v722_v51  ;;  %v723_v52 = vld [vmem:[%s1196_s0 + $0xd4] sm:$0xf] }
  0x22   :  { %v724_v53 = vld [vmem:[%s1196_s0 + $0xd0] sm:$0xf]  ;;  %v725_v54 = vld [vmem:[%s1196_s0 + $0xcc] sm:$0xf]  ;;  %59 = vst [vmem:[#allocation0 + $0x1a8] sm:$0xf] %v723_v52 }
  0x23   :  { %v423_v55 = vld [vmem:[#allocation0 + $0x143] ss:$8 sm:$0xf]   ;;  %64 = vst [vmem:[#allocation0 + $0x1a0] sm:$0xf] %v724_v53 }
  0x24   :  { %69 = vst [vmem:[#allocation0 + $0x198] sm:$0xf] %v725_v54  ;;  %v726_v56 = vld [vmem:[%s1196_s0 + $0xc8] sm:$0xf]  ;;  %v427_v57 = vsel %vm323_vm0, %v425_v50, %v423_v55  ;;  %v727_v58 = vld [vmem:[%s1196_s0 + $0xc4] sm:$0xf] }
  0x25   :  { %74 = vst [vmem:[#allocation0 + $0x190] sm:$0xf] %v726_v56  ;;  %v728_v59 = vld [vmem:[%s1196_s0 + $0xc0] sm:$0xf]  ;;  %v745_v60 = vld [vmem:[%s1196_s0 + $0x7c] sm:$0xf]  ;;  %428 = vrot.lane.b32.xlu1 %v427_v57, %s807_s10 }
  0x26   :  { %79 = vst [vmem:[#allocation0 + $0x188] sm:$0xf] %v727_v58  ;;  %84 = vst [vmem:[#allocation0 + $0x180] sm:$0xf] %v728_v59  ;;  %v746_v61 = vld [vmem:[%s1196_s0 + $0x78] sm:$0xf] }
  0x27   :  { %169 = vst [vmem:[#allocation0 + $0xf8] sm:$0xf] %v745_v60  ;;  %v747_v62 = vld [vmem:[%s1196_s0 + $0x74] sm:$0xf]  ;;  %v748_v63 = vld [vmem:[%s1196_s0 + $0x70] sm:$0xf] }
  0x28   :  { %v436_v0 = vld [vmem:[#allocation0 + $0x83] ss:$8 sm:$0xf0]   ;;  %174 = vst [vmem:[#allocation0 + $0xf0] sm:$0xf] %v746_v61 }
  0x29   :  { %179 = vst [vmem:[#allocation0 + $0xe8] sm:$0xf] %v747_v62  ;;  %184 = vst [vmem:[#allocation0 + $0xe0] sm:$0xf] %v748_v63  ;;  %v749_v1 = vld [vmem:[%s1196_s0 + $0x6c] sm:$0xf] }
  0x2a   :  { %189 = vst [vmem:[#allocation0 + $0xd8] sm:$0xf] %v749_v1  ;;  %v750_v2 = vld [vmem:[%s1196_s0 + $0x68] sm:$0xf]  ;;  %v751_v3 = vld [vmem:[%s1196_s0 + $0x64] sm:$0xf] }
  0x2b   :  { %v752_v4 = vld [vmem:[%s1196_s0 + $0x60] sm:$0xf]  ;;  %194 = vst [vmem:[#allocation0 + $0xd0] sm:$0xf] %v750_v2  ;;  %199 = vst [vmem:[#allocation0 + $0xc8] sm:$0xf] %v751_v3 }
  0x2c   :  { %v434_v5 = vld [vmem:[#allocation0 + $0x83] ss:$8 sm:$0xf]   ;;  %204 = vst [vmem:[#allocation0 + $0xc0] sm:$0xf] %v752_v4 }
  0x2d   :  { %v713_v6 = vld [vmem:[%s1196_s0 + $0xfc] sm:$0xf]  ;;  %v438_v7 = vsel %vm323_vm0, %v436_v0, %v434_v5  ;;  %v714_v8 = vld [vmem:[%s1196_s0 + $0xf8] sm:$0xf]  ;;  %v715_v9 = vld [vmem:[%s1196_s0 + $0xf4] sm:$0xf] }
  0x2e   :  { %9 = vst [vmem:[#allocation0 + $0x1f8] sm:$0xf] %v713_v6  ;;  %v716_v10 = vld [vmem:[%s1196_s0 + $0xf0] sm:$0xf]  ;;  %439 = vrot.lane.b32.xlu0 %v438_v7, %s807_s10  ;;  %14 = vst [vmem:[#allocation0 + $0x1f0] sm:$0xf] %v714_v8 }
  0x2f   :  { %v447_v11 = vld [vmem:[#allocation0 + $0x183] ss:$8 sm:$0xf0]   ;;  %19 = vst [vmem:[#allocation0 + $0x1e8] sm:$0xf] %v715_v9 }
  0x30   :  { %24 = vst [vmem:[#allocation0 + $0x1e0] sm:$0xf] %v716_v10  ;;  %v717_v12 = vld [vmem:[%s1196_s0 + $0xec] sm:$0xf]  ;;  %v718_v13 = vld [vmem:[%s1196_s0 + $0xe8] sm:$0xf] }
  0x31   :  { %29 = vst [vmem:[#allocation0 + $0x1d8] sm:$0xf] %v717_v12  ;;  %v719_v14 = vld [vmem:[%s1196_s0 + $0xe4] sm:$0xf]  ;;  %v720_v15 = vld [vmem:[%s1196_s0 + $0xe0] sm:$0xf] }
  0x32   :  { %v445_v16 = vld [vmem:[#allocation0 + $0x183] ss:$8 sm:$0xf]   ;;  %34 = vst [vmem:[#allocation0 + $0x1d0] sm:$0xf] %v718_v13  ;;  %s808_s0 = smov 16  }
  0x33   :  { %39 = vst [vmem:[#allocation0 + $0x1c8] sm:$0xf] %v719_v14  ;;  %44 = vst [vmem:[#allocation0 + $0x1c0] sm:$0xf] %v720_v15  ;;  %v449_v17 = vsel %vm323_vm0, %v447_v11, %v445_v16 }
  0x34   :  { %v458_v18 = vld [vmem:[#allocation0 + $0xc3] ss:$8 sm:$0xf0]   ;;  %450 = vrot.lane.b32.xlu1 %v449_v17, %s807_s10  ;;  %v478_v19 = vld [vmem:[#allocation0 + $0x2] ss:$8 sm:$0xf]  }
  0x35   :  { %v456_v20 = vld [vmem:[#allocation0 + $0xc3] ss:$8 sm:$0xf]   ;;  %v480_v21 = vld [vmem:[#allocation0 + $0x2] ss:$8 sm:$0xf0]  }
  0x36   :  { %v460_v22 = vsel %vm323_vm0, %v458_v18, %v456_v20  ;;  %v488_v24 = vld [vmem:[#allocation0 + $0x102] ss:$8 sm:$0xf]   ;;  %v482_v25 = vsel %vm323_vm0, %v480_v21, %v478_v19  ;;  %v565_v45 = vld [vmem:[#allocation0 + $0x1] ss:$8 sm:$0xf]  }
  0x37   :  { %461 = vrot.lane.b32.xlu0 %v460_v22, %s807_s10  ;;  %v469_v23 = vld [vmem:[#allocation0 + $0x1c3] ss:$8 sm:$0xf0]   ;;  %v490_v26 = vld [vmem:[#allocation0 + $0x102] ss:$8 sm:$0xf0]  }
  0x38   :  { %v499_v27 = vld [vmem:[#allocation0 + $0x42] ss:$8 sm:$0xf]   ;;  %v492_v31 = vsel %vm323_vm0, %v490_v26, %v488_v24  ;;  %v567_v48 = vld [vmem:[#allocation0 + $0x1] ss:$8 sm:$0xf0]  }
  0x39   :  { %v501_v29 = vld [vmem:[#allocation0 + $0x42] ss:$8 sm:$0xf0]   ;;  %v321_v49 = vld [vmem:[#allocation0] ss:$8 sm:$0xf]   ;;  %v569_v63 = vsel %vm323_vm0, %v567_v48, %v565_v45 }
  0x3a   :  { %v467_v28 = vld [vmem:[#allocation0 + $0x1c3] ss:$8 sm:$0xf]   ;;  %v503_v32 = vsel %vm323_vm0, %v501_v29, %v499_v27  ;;  %v510_v33 = vld [vmem:[#allocation0 + $0x142] ss:$8 sm:$0xf]  }
  0x3b   :  { %v471_v30 = vsel %vm323_vm0, %v469_v23, %v467_v28  ;;  %483 = vrot.lane.b32.xlu0 %v482_v25, %s808_s0  ;;  %v512_v34 = vld [vmem:[#allocation0 + $0x142] ss:$8 sm:$0xf0]   ;;  %v322_v50 = vld [vmem:[#allocation0] ss:$8 sm:$0xf0]  }
  0x3c   :  { %472 = vrot.lane.b32.xlu1 %v471_v30, %s807_s10  ;;  %v521_v35 = vld [vmem:[#allocation0 + $0x82] ss:$8 sm:$0xf]   ;;  %v514_v37 = vsel %vm323_vm0, %v512_v34, %v510_v33  ;;  %v328_v51 = vld [vmem:[#allocation0 + $0x40] ss:$8 sm:$0xf]   ;;  %v324_v52 = vsel %vm323_vm0, %v322_v50, %v321_v49 }
  0x3d   :  { %v523_v36 = vld [vmem:[#allocation0 + $0x82] ss:$8 sm:$0xf0]   ;;  %v330_v53 = vld [vmem:[#allocation0 + $0x40] ss:$8 sm:$0xf0]  }
  0x3e   :  { %v525_v38 = vsel %vm323_vm0, %v523_v36, %v521_v35  ;;  %v532_v39 = vld [vmem:[#allocation0 + $0x182] ss:$8 sm:$0xf]   ;;  %v355_v54 = vld [vmem:[#allocation0 + $0x100] ss:$8 sm:$0xf]   ;;  %v332_v59 = vsel %vm323_vm0, %v330_v53, %v328_v51 }
  0x3f   :  { %504 = vrot.lane.b32.xlu0 %v503_v32, %s808_s0  ;;  %v534_v40 = vld [vmem:[#allocation0 + $0x182] ss:$8 sm:$0xf0]   ;;  %v575_v55 = vld [vmem:[#allocation0 + $0x101] ss:$8 sm:$0xf]  }
  0x40   :  { %493 = vrot.lane.b32.xlu1 %v492_v31, %s808_s0  ;;  %v543_v41 = vld [vmem:[#allocation0 + $0xc2] ss:$8 sm:$0xf]   ;;  %v536_v46 = vsel %vm323_vm0, %v534_v40, %v532_v39  ;;  %v577_v56 = vld [vmem:[#allocation0 + $0x101] ss:$8 sm:$0xf0]  }
  0x41   :  { %v545_v42 = vld [vmem:[#allocation0 + $0xc2] ss:$8 sm:$0xf0]   ;;  %v586_v57 = vld [vmem:[#allocation0 + $0x41] ss:$8 sm:$0xf]   ;;  %v579_v13 = vsel %vm323_vm0, %v577_v56, %v575_v55 }
  0x42   :  { %v554_v43 = vld [vmem:[#allocation0 + $0x1c2] ss:$8 sm:$0xf]   ;;  %v547_v47 = vsel %vm323_vm0, %v545_v42, %v543_v41  ;;  %v588_v58 = vld [vmem:[#allocation0 + $0x41] ss:$8 sm:$0xf0]  }
  0x43   :  { %526 = vrot.lane.b32.xlu0 %v525_v38, %s808_s0  ;;  %v556_v44 = vld [vmem:[#allocation0 + $0x1c2] ss:$8 sm:$0xf0]   ;;  %326 = vst.msk [vmem:[%s1197_s1] sm:$0xff] %vm325_vm1, %v324_v52   ;;  %776 = vst.msk [vmem:[%s1197_s1 + $0x8] sm:$0xff] %vm325_vm1, %v332_v59   ;;  %v590_v14 = vsel %vm323_vm0, %v588_v58, %v586_v57 }
  0x44   :  { %515 = vrot.lane.b32.xlu1 %v514_v37, %s808_s0  ;;  %v357_v60 = vld [vmem:[#allocation0 + $0x100] ss:$8 sm:$0xf0]   ;;  %v558_v62 = vsel %vm323_vm0, %v556_v44, %v554_v43  ;;  %v597_v9 = vld [vmem:[#allocation0 + $0x141] ss:$8 sm:$0xf]  }
  0x45   :  { %v364_v61 = vld [vmem:[#allocation0 + $0x140] ss:$8 sm:$0xf]   ;;  %v359_v0 = vsel %vm323_vm0, %v357_v60, %v355_v54  ;;  %v599_v15 = vld [vmem:[#allocation0 + $0x141] ss:$8 sm:$0xf0]  }
  0x46   :  { %v366_v1 = vld [vmem:[#allocation0 + $0x140] ss:$8 sm:$0xf0]   ;;  %779 = vst.msk [vmem:[%s1197_s1 + $0x20] sm:$0xff] %vm325_vm1, %v359_v0   ;;  %v601_v21 = vsel %vm323_vm0, %v599_v15, %v597_v9 }
  0x47   :  { %548 = vrot.lane.b32.xlu0 %v547_v47, %s808_s0  ;;  %v337_v2 = vld [vmem:[#allocation0 + $0x80] ss:$8 sm:$0xf]   ;;  %v368_v3 = vsel %vm323_vm0, %v366_v1, %v364_v61  ;;  %v608_v18 = vld [vmem:[#allocation0 + $0x81] ss:$8 sm:$0xf]  }
  0x48   :  { %537 = vrot.lane.b32.xlu1 %v536_v46, %s808_s0  ;;  %v339_v4 = vld [vmem:[#allocation0 + $0x80] ss:$8 sm:$0xf0]   ;;  %780 = vst.msk [vmem:[%s1197_s1 + $0x28] sm:$0xff] %vm325_vm1, %v368_v3  }
  0x49   :  { %v373_v5 = vld [vmem:[#allocation0 + $0x180] ss:$8 sm:$0xf]   ;;  %v341_v6 = vsel %vm323_vm0, %v339_v4, %v337_v2  ;;  %v610_v19 = vld [vmem:[#allocation0 + $0x81] ss:$8 sm:$0xf0]  }
  0x4a   :  { %v375_v7 = vld [vmem:[#allocation0 + $0x180] ss:$8 sm:$0xf0]   ;;  %777 = vst.msk [vmem:[%s1197_s1 + $0x10] sm:$0xff] %vm325_vm1, %v341_v6   ;;  %v612_v22 = vsel %vm323_vm0, %v610_v19, %v608_v18 }
  0x4b   :  { %v346_v8 = vld [vmem:[#allocation0 + $0xc0] ss:$8 sm:$0xf]   ;;  %570 = vrot.lane.b32.xlu0 %v569_v63, %s809_s28  ;;  %v377_v10 = vsel %vm323_vm0, %v375_v7, %v373_v5  ;;  %v619_v23 = vld [vmem:[#allocation0 + $0x181] ss:$8 sm:$0xf]  }
  0x4c   :  { %559 = vrot.lane.b32.xlu1 %v558_v62, %s808_s0  ;;  %v348_v11 = vld [vmem:[#allocation0 + $0xc0] ss:$8 sm:$0xf0]   ;;  %781 = vst.msk [vmem:[%s1197_s1 + $0x30] sm:$0xff] %vm325_vm1, %v377_v10  }
  0x4d   :  { %v382_v12 = vld [vmem:[#allocation0 + $0x1c0] ss:$8 sm:$0xf]   ;;  %v350_v16 = vsel %vm323_vm0, %v348_v11, %v346_v8  ;;  %v621_v24 = vld [vmem:[#allocation0 + $0x181] ss:$8 sm:$0xf0]  }
  0x4e   :  { %v384_v17 = vld [vmem:[#allocation0 + $0x1c0] ss:$8 sm:$0xf0]   ;;  %778 = vst.msk [vmem:[%s1197_s1 + $0x18] sm:$0xff] %vm325_vm1, %v350_v16   ;;  %v623_v27 = vsel %vm323_vm0, %v621_v24, %v619_v23 }
  0x4f   :  { %v386_v20 = vsel %vm323_vm0, %v384_v17, %v382_v12  ;;  %591 = vrot.lane.b32.xlu0 %v590_v14, %s809_s28  ;;  %v630_v25 = vld [vmem:[#allocation0 + $0xc1] ss:$8 sm:$0xf]  }
  0x50   :  { %782 = vst.msk [vmem:[%s1197_s1 + $0x38] sm:$0xff] %vm325_vm1, %v386_v20   ;;  %580 = vrot.lane.b32.xlu1 %v579_v13, %s809_s28  ;;  %v632_v26 = vld [vmem:[#allocation0 + $0xc1] ss:$8 sm:$0xf0]  }
  0x51   :  { %v634_v28 = vsel %vm323_vm0, %v632_v26, %v630_v25  ;;  %v641_v29 = vld [vmem:[#allocation0 + $0x1c1] ss:$8 sm:$0xf]  }
  0x52   :  { %v643_v30 = vld [vmem:[#allocation0 + $0x1c1] ss:$8 sm:$0xf0]  }
  0x53   :  { %613 = vrot.lane.b32.xlu0 %v612_v22, %s809_s28  ;;  %v645_v31 = vsel %vm323_vm0, %v643_v30, %v641_v29 }
  0x54   :  { %602 = vrot.lane.b32.xlu1 %v601_v21, %s809_s28 }
  0x57   :  { %635 = vrot.lane.b32.xlu0 %v634_v28, %s809_s28 }
  0x58   :  { %624 = vrot.lane.b32.xlu1 %v623_v27, %s809_s28 }
  0x5c   :  { %646 = vrot.lane.b32.xlu1 %v645_v31, %s809_s28 }
  0x87   :  { %v397_v32 = vpop.permute.xlu0 %396  }
  0x88   :  { %399 = vst.msk [vmem:[%s1197_s1] sm:$0xff] %vm398_vm2, %v397_v32  }
  0x8c   :  { %v418_v33 = vpop.permute.xlu1 %417  }
  0x8d   :  { %784 = vst.msk [vmem:[%s1197_s1 + $0x8] sm:$0xff] %vm398_vm2, %v418_v33  }
  0x90   :  { %v407_v34 = vpop.permute.xlu0 %406  }
  0x91   :  { %783 = vst.msk [vmem:[%s1197_s1 + $0x20] sm:$0xff] %vm398_vm2, %v407_v34  }
  0x97   :  { %v429_v35 = vpop.permute.xlu1 %428  }
  0x98   :  { %785 = vst.msk [vmem:[%s1197_s1 + $0x28] sm:$0xff] %vm398_vm2, %v429_v35  }
  0xa0   :  { %v440_v36 = vpop.permute.xlu0 %439  }
  0xa1   :  { %786 = vst.msk [vmem:[%s1197_s1 + $0x10] sm:$0xff] %vm398_vm2, %v440_v36  }
  0xa6   :  { %v451_v37 = vpop.permute.xlu1 %450  }
  0xa7   :  { %787 = vst.msk [vmem:[%s1197_s1 + $0x30] sm:$0xff] %vm398_vm2, %v451_v37  }
  0xa9   :  { %v462_v38 = vpop.permute.xlu0 %461  }
  0xaa   :  { %788 = vst.msk [vmem:[%s1197_s1 + $0x18] sm:$0xff] %vm398_vm2, %v462_v38  }
  0xad   :  { %v484_v40 = vpop.permute.xlu0 %483  }
  0xae   :  { %v473_v39 = vpop.permute.xlu1 %472   ;;  %486 = vst.msk [vmem:[%s1197_s1] sm:$0xff] %vm485_vm3, %v484_v40  }
  0xaf   :  { %789 = vst.msk [vmem:[%s1197_s1 + $0x38] sm:$0xff] %vm398_vm2, %v473_v39  }
  0xb1   :  { %v505_v42 = vpop.permute.xlu0 %504  }
  0xb2   :  { %v494_v41 = vpop.permute.xlu1 %493   ;;  %791 = vst.msk [vmem:[%s1197_s1 + $0x8] sm:$0xff] %vm485_vm3, %v505_v42  }
  0xb3   :  { %790 = vst.msk [vmem:[%s1197_s1 + $0x20] sm:$0xff] %vm485_vm3, %v494_v41  }
  0xb5   :  { %v527_v44 = vpop.permute.xlu0 %526  }
  0xb6   :  { %v516_v43 = vpop.permute.xlu1 %515   ;;  %793 = vst.msk [vmem:[%s1197_s1 + $0x10] sm:$0xff] %vm485_vm3, %v527_v44  }
  0xb7   :  { %792 = vst.msk [vmem:[%s1197_s1 + $0x28] sm:$0xff] %vm485_vm3, %v516_v43  }
  0xb9   :  { %v549_v46 = vpop.permute.xlu0 %548  }
  0xba   :  { %v538_v45 = vpop.permute.xlu1 %537   ;;  %795 = vst.msk [vmem:[%s1197_s1 + $0x18] sm:$0xff] %vm485_vm3, %v549_v46  }
  0xbb   :  { %794 = vst.msk [vmem:[%s1197_s1 + $0x30] sm:$0xff] %vm485_vm3, %v538_v45  }
  0xbd   :  { %v571_v48 = vpop.permute.xlu0 %570  }
  0xbe   :  { %v560_v47 = vpop.permute.xlu1 %559   ;;  %573 = vst.msk [vmem:[%s1197_s1] sm:$0xff] %vm572_vm4, %v571_v48  }
  0xbf   :  { %796 = vst.msk [vmem:[%s1197_s1 + $0x38] sm:$0xff] %vm485_vm3, %v560_v47  }
  0xc1   :  { %v592_v50 = vpop.permute.xlu0 %591  }
  0xc2   :  { %v581_v49 = vpop.permute.xlu1 %580   ;;  %798 = vst.msk [vmem:[%s1197_s1 + $0x8] sm:$0xff] %vm572_vm4, %v592_v50  }
  0xc3   :  { %797 = vst.msk [vmem:[%s1197_s1 + $0x20] sm:$0xff] %vm572_vm4, %v581_v49  }
  0xc5   :  { %v614_v52 = vpop.permute.xlu0 %613  }
  0xc6   :  { %v603_v51 = vpop.permute.xlu1 %602   ;;  %800 = vst.msk [vmem:[%s1197_s1 + $0x10] sm:$0xff] %vm572_vm4, %v614_v52  }
  0xc7   :  { %799 = vst.msk [vmem:[%s1197_s1 + $0x28] sm:$0xff] %vm572_vm4, %v603_v51  }
  0xc9   :  { %v636_v54 = vpop.permute.xlu0 %635  }
  0xca   :  { %v625_v53 = vpop.permute.xlu1 %624   ;;  %802 = vst.msk [vmem:[%s1197_s1 + $0x18] sm:$0xff] %vm572_vm4, %v636_v54  }
  0xcb   :  { %801 = vst.msk [vmem:[%s1197_s1 + $0x30] sm:$0xff] %vm572_vm4, %v625_v53  }
  0xce   :  { %v647_v55 = vpop.permute.xlu1 %646  }
  0xcf   :  { %803 = vst.msk [vmem:[%s1197_s1 + $0x38] sm:$0xff] %vm572_vm4, %v647_v55  }

// kernel: transformer_forward.8
= control target key start
LH: loop header
LB: loop body
LE: loop exit
PB: predicated region body
PF: predicated region fallthrough
CT: control target
= control target key end

     0   :  { %vm28_vm0 = vcmask 261120   ;;  %vm282_vm1 = vcmask 785408   ;;  %s544_s0 = inlined_call_operand.vmem [shape: f32[64,32], index: 0, kind: input, shape index: {}]   ;;  %s545_s3 = inlined_call_operand.vmem [shape: bf16[32,96], index: 3, kind: input, shape index: {}]   ;;  %s546_s1 = inlined_call_operand.vmem [shape: f32[1,32], index: 1, kind: input, shape index: {}]   ;;  %s547_s2 = inlined_call_operand.vmem [shape: f32[1,32], index: 2, kind: input, shape index: {}]   ;;  %s548_s4 = inlined_call_operand.vmem [shape: f32[64,96], index: 4, kind: output, shape index: {}]  }
   0x1   :  { %v371_v0 = vld [vmem:[%s544_s0 + $0x20] sm:$0xff]  ;;  %v381_v2 = vld [vmem:[%s544_s0 + $0x28] sm:$0xff]  ;;  %v399_v8 = vld [vmem:[%s544_s0 + $0x18] sm:$0xff] }
   0x2   :  { %v376_v1 = vld [vmem:[%s544_s0] sm:$0xff]  ;;  %v41_v3 = vsel %vm28_vm0, %v371_v0, 0.0  ;;  %v390_v5 = vld [vmem:[%s544_s0 + $0x8] sm:$0xff]  ;;  %v44_v6 = vsel %vm28_vm0, %v381_v2, 0.0  ;;  %v404_v9 = vld [vmem:[%s544_s0 + $0x10] sm:$0xff]  ;;  %v38_v10 = vsel %vm28_vm0, %v399_v8, 0.0  ;;  %v58_v20 = vmul.f32 %v381_v2, %v381_v2 }
   0x3   :  { %v29_v4 = vsel %vm28_vm0, %v376_v1, 0.0  ;;  %42 = vadd.xlane.f32.xlu1 %v41_v3  ;;  %v32_v7 = vsel %vm28_vm0, %v390_v5, 0.0  ;;  %v35_v11 = vsel %vm28_vm0, %v404_v9, 0.0  ;;  %v413_v12 = vld [vmem:[%s544_s0 + $0x38] sm:$0xff]  ;;  %v418_v13 = vld [vmem:[%s544_s0 + $0x30] sm:$0xff]  ;;  %v54_v16 = vmul.f32 %v390_v5, %v390_v5  ;;  %v325_v32 = vld [vmem:[%s545_s3 + $0x8] sm:$0xff]  }
   0x4   :  { %30 = vadd.xlane.f32.xlu0 %v29_v4  ;;  %v50_v14 = vsel %vm28_vm0, %v413_v12, 0.0  ;;  %v47_v15 = vsel %vm28_vm0, %v418_v13, 0.0  ;;  %v53_v17 = vmul.f32 %v376_v1, %v376_v1  ;;  %v57_v21 = vmul.f32 %v371_v0, %v371_v0  ;;  %309 = vmatprep.subr.bf16.mxu0 %v325_v32  ;;  %v326_v33 = vld [vmem:[%s545_s3] sm:$0xff]  }
   0x5   :  { %v64_v18 = vsel %vm28_vm0, %v54_v16, 0.0  ;;  %v76_v22 = vsel %vm28_vm0, %v58_v20, 0.0  ;;  %v56_v24 = vmul.f32 %v399_v8, %v399_v8  ;;  %v55_v25 = vmul.f32 %v404_v9, %v404_v9  ;;  %321 = vmatprep.subr.bf16.mxu1 %v325_v32  ;;  %310 = vmatpush3.bf16.msra.mxu0 %v325_v32 }
   0x6   :  { %v61_v19 = vsel %vm28_vm0, %v53_v17, 0.0  ;;  %v73_v23 = vsel %vm28_vm0, %v57_v21, 0.0  ;;  %v60_v28 = vmul.f32 %v413_v12, %v413_v12  ;;  %v59_v29 = vmul.f32 %v418_v13, %v418_v13  ;;  %323 = vmatpush3.bf16.msra.mxu1 %v325_v32  ;;  %311 = vmatprep.subr.bf16.mxu0 %v326_v33 }
   0x7   :  { %45 = vadd.xlane.f32.xlu1 %v44_v6  ;;  %v70_v26 = vsel %vm28_vm0, %v56_v24, 0.0  ;;  %v67_v27 = vsel %vm28_vm0, %v55_v25, 0.0  ;;  %322 = vmatprep.subr.bf16.mxu1 %v326_v33 }
   0x8   :  { %33 = vadd.xlane.f32.xlu0 %v32_v7  ;;  %v82_v30 = vsel %vm28_vm0, %v60_v28, 0.0  ;;  %v79_v31 = vsel %vm28_vm0, %v59_v29, 0.0 }
   0x9   :  { %312 = vmatpush3.bf16.msra.mxu0 %v326_v33 }
   0xa   :  { %324 = vmatpush3.bf16.msra.mxu1 %v326_v33 }
   0xb   :  { %39 = vadd.xlane.f32.xlu1 %v38_v10 }
   0xc   :  { %36 = vadd.xlane.f32.xlu0 %v35_v11 }
   0xf   :  { %51 = vadd.xlane.f32.xlu1 %v50_v14 }
  0x10   :  { %48 = vadd.xlane.f32.xlu0 %v47_v15 }
  0x13   :  { %65 = vadd.xlane.f32.xlu1 %v64_v18 }
  0x14   :  { %62 = vadd.xlane.f32.xlu0 %v61_v19 }
  0x17   :  { %77 = vadd.xlane.f32.xlu1 %v76_v22 }
  0x18   :  { %74 = vadd.xlane.f32.xlu0 %v73_v23 }
  0x1b   :  { %71 = vadd.xlane.f32.xlu1 %v70_v26 }
  0x1c   :  { %68 = vadd.xlane.f32.xlu0 %v67_v27 }
  0x1f   :  { %83 = vadd.xlane.f32.xlu1 %v82_v30 }
  0x20   :  { %80 = vadd.xlane.f32.xlu0 %v79_v31 }
  0x8c   :  { %v43_v34 = vpop.xlane.xlu1 %42 }
  0x8d   :  { %v31_v35 = vpop.xlane.xlu0 %30  ;;  %v458_v44 = vmul.f32 0.03125, %v43_v34 }
  0x8e   :  { %v454_v42 = vmul.f32 0.03125, %v31_v35 }
  0x8f   :  { %v105_v54 = vmul.f32 %v458_v44, %v458_v44 }
  0x90   :  { %v46_v36 = vpop.xlane.xlu1 %45  ;;  %v101_v48 = vmul.f32 %v454_v42, %v454_v42 }
  0x91   :  { %v34_v37 = vpop.xlane.xlu0 %33  ;;  %v460_v45 = vmul.f32 0.03125, %v46_v36 }
  0x92   :  { %v456_v43 = vmul.f32 0.03125, %v34_v37 }
  0x93   :  { %v106_v55 = vmul.f32 %v460_v45, %v460_v45 }
  0x94   :  { %v40_v38 = vpop.xlane.xlu1 %39  ;;  %v102_v49 = vmul.f32 %v456_v43, %v456_v43 }
  0x95   :  { %v37_v39 = vpop.xlane.xlu0 %36  ;;  %v470_v56 = vmul.f32 0.03125, %v40_v38 }
  0x96   :  { %v472_v63 = vmul.f32 0.03125, %v37_v39 }
  0x97   :  { %v104_v10 = vmul.f32 %v470_v56, %v470_v56 }
  0x98   :  { %v52_v40 = vpop.xlane.xlu1 %51  ;;  %v103_v20 = vmul.f32 %v472_v63, %v472_v63 }
  0x99   :  { %v49_v41 = vpop.xlane.xlu0 %48  ;;  %v476_v11 = vmul.f32 0.03125, %v52_v40 }
  0x9a   :  { %v478_v14 = vmul.f32 0.03125, %v49_v41 }
  0x9b   :  { %v108_v25 = vmul.f32 %v476_v11, %v476_v11 }
  0x9c   :  { %v66_v46 = vpop.xlane.xlu1 %65  ;;  %v107_v26 = vmul.f32 %v478_v14, %v478_v14 }
  0x9d   :  { %v63_v47 = vpop.xlane.xlu0 %62  ;;  %v94_v50 = vmul.f32 0.03125, %v66_v46  ;;  %v126_v46 = vsub.f32 %v390_v5, %v456_v43  ;;  %v130_v5 = vsub.f32 %v381_v2, %v460_v45 }
  0x9e   :  { %v93_v51 = vmul.f32 0.03125, %v63_v47 }
  0x9f   :  { %v110_v52 = vsub.f32 %v94_v50, %v102_v49  ;;  %v295_v49 = vld [vmem:[%s546_s1] ss:$0 sm:$0xff] }
  0xa0   :  { %v109_v53 = vsub.f32 %v93_v51, %v101_v48  ;;  %v78_v57 = vpop.xlane.xlu1 %77  ;;  %v125_v48 = vsub.f32 %v376_v1, %v454_v42  ;;  %v129_v1 = vsub.f32 %v371_v0, %v458_v44 }
  0xa1   :  { %v75_v58 = vpop.xlane.xlu0 %74  ;;  %v118_v59 = vmax.f32 %v110_v52, 0.0  ;;  %v98_v61 = vmul.f32 0.03125, %v78_v57  ;;  %v296_v52 = vld [vmem:[%s547_s2] ss:$0 sm:$0xff] }
  0xa2   :  { %v117_v60 = vmax.f32 %v109_v53, 0.0  ;;  %v97_v62 = vmul.f32 0.03125, %v75_v58 }
  0xa3   :  { %v134_v3 = vadd.f32 1e-05, %v118_v59  ;;  %v114_v6 = vsub.f32 %v98_v61, %v106_v55  ;;  %v128_v61 = vsub.f32 %v399_v8, %v470_v56  ;;  %v131_v8 = vsub.f32 %v418_v13, %v478_v14 }
  0xa4   :  { %v133_v4 = vadd.f32 1e-05, %v117_v60  ;;  %v113_v7 = vsub.f32 %v97_v62, %v105_v54  ;;  %v72_v15 = vpop.xlane.xlu1 %71 }
  0xa5   :  { %v69_v16 = vpop.xlane.xlu0 %68  ;;  %327 = vrsqrt.f32 %v134_v3  ;;  %v122_v17 = vmax.f32 %v114_v6, 0.0  ;;  %v96_v19 = vmul.f32 0.03125, %v72_v15  ;;  %v132_v15 = vsub.f32 %v413_v12, %v476_v11 }
  0xa6   :  { %v121_v18 = vmax.f32 %v113_v7, 0.0  ;;  %329 = vrsqrt.f32 %v133_v4  ;;  %v95_v21 = vmul.f32 0.03125, %v69_v16  ;;  %v127_v4 = vsub.f32 %v404_v9, %v472_v63 }
  0xa7   :  { %v138_v22 = vadd.f32 1e-05, %v122_v17  ;;  %v112_v24 = vsub.f32 %v96_v19, %v104_v10 }
  0xa8   :  { %v137_v23 = vadd.f32 1e-05, %v121_v18  ;;  %v111_v27 = vsub.f32 %v95_v21, %v103_v20  ;;  %v84_v28 = vpop.xlane.xlu1 %83 }
  0xa9   :  { %v81_v29 = vpop.xlane.xlu0 %80  ;;  %331 = vrsqrt.f32 %v138_v22  ;;  %v120_v30 = vmax.f32 %v112_v24, 0.0  ;;  %v100_v31 = vmul.f32 0.03125, %v84_v28 }
  0xaa   :  { %v99_v32 = vmul.f32 0.03125, %v81_v29  ;;  %333 = vrsqrt.f32 %v137_v23  ;;  %v119_v33 = vmax.f32 %v111_v27, 0.0 }
  0xab   :  { %v136_v34 = vadd.f32 1e-05, %v120_v30  ;;  %v116_v35 = vsub.f32 %v100_v31, %v108_v25 }
  0xac   :  { %v115_v36 = vsub.f32 %v99_v32, %v107_v26  ;;  %v135_v37 = vadd.f32 1e-05, %v119_v33 }
  0xad   :  { %335 = vrsqrt.f32 %v136_v34  ;;  %v124_v38 = vmax.f32 %v116_v35, 0.0 }
  0xae   :  { %v123_v39 = vmax.f32 %v115_v36, 0.0  ;;  %337 = vrsqrt.f32 %v135_v37 }
  0xaf   :  { %v140_v40 = vadd.f32 1e-05, %v124_v38 }
  0xb0   :  { %v139_v41 = vadd.f32 1e-05, %v123_v39 }
  0xb1   :  { %339 = vrsqrt.f32 %v140_v40 }
  0xb2   :  { %v328_v47 = vpop.eup %327  ;;  %341 = vrsqrt.f32 %v139_v41 }
  0xb3   :  { %v330_v50 = vpop.eup %329  ;;  %v150_v51 = vmul.f32 %v328_v47, %v126_v46 }
  0xb4   :  { %v149_v53 = vmul.f32 %v330_v50, %v125_v48 }
  0xb5   :  { %v164_v43 = vmul.f32 %v295_v49, %v150_v51 }
  0xb6   :  { %v332_v54 = vpop.eup %331  ;;  %v163_v42 = vmul.f32 %v295_v49, %v149_v53 }
  0xb7   :  { %v334_v55 = vpop.eup %333  ;;  %v178_v57 = vadd.f32 %v296_v52, %v164_v43  ;;  %v154_v58 = vmul.f32 %v332_v54, %v130_v5 }
  0xb8   :  { %v177_v59 = vadd.f32 %v296_v52, %v163_v42  ;;  %v153_v60 = vmul.f32 %v334_v55, %v129_v1 }
  0xb9   :  { %v168_v62 = vmul.f32 %v295_v49, %v154_v58 }
  0xba   :  { %v336_v3 = vpop.eup %335  ;;  %v185_v2 = vpack.c.bf16 %v178_v57, %v177_v59  ;;  %v167_v45 = vmul.f32 %v295_v49, %v153_v60 }
  0xbb   :  { %v338_v6 = vpop.eup %337  ;;  %v182_v7 = vadd.f32 %v296_v52, %v168_v62  ;;  %v152_v10 = vmul.f32 %v336_v3, %v128_v61 }
  0xbc   :  { %313 = vmatprep.mubr.msk.bf16.mxu0 %vm28_vm0, %v185_v2  ;;  %v181_v0 = vadd.f32 %v296_v52, %v167_v45  ;;  %v151_v44 = vmul.f32 %v338_v6, %v127_v4 }
  0xbd   :  { %v166_v16 = vmul.f32 %v295_v49, %v152_v10 }
  0xbe   :  { %v340_v17 = vpop.eup %339  ;;  %v187_v56 = vpack.c.bf16 %v182_v7, %v181_v0  ;;  %v165_v18 = vmul.f32 %v295_v49, %v151_v44 }
  0xbf   :  { %v342_v9 = vpop.eup %341  ;;  %v180_v63 = vadd.f32 %v296_v52, %v166_v16  ;;  %v156_v19 = vmul.f32 %v340_v17, %v132_v15 }
  0xc0   :  { %317 = vmatprep.mubr.msk.bf16.mxu1 %vm28_vm0, %v187_v56  ;;  %v179_v20 = vadd.f32 %v296_v52, %v165_v18  ;;  %v155_v21 = vmul.f32 %v342_v9, %v131_v8 }
  0xc1   :  { %v170_v22 = vmul.f32 %v295_v49, %v156_v19 }
  0xc2   :  { %v186_v23 = vpack.c.bf16 %v180_v63, %v179_v20  ;;  %v169_v24 = vmul.f32 %v295_v49, %v155_v21 }
  0xc3   :  { %v184_v25 = vadd.f32 %v296_v52, %v170_v22 }
  0xc4   :  { %314 = vmatmul.mubr.msk.bf16.vlgmr.msra.gmra.mxu0 %vm28_vm0, %v186_v23  ;;  %v183_v12 = vadd.f32 %v296_v52, %v169_v24 }
  0xc6   :  { %v188_v11 = vpack.c.bf16 %v184_v25, %v183_v12 }
  0xc8   :  { %318 = vmatmul.mubr.msk.bf16.vlgmr.msra.gmra.mxu1 %vm28_vm0, %v188_v11 }
 0x184   :  { %v315_v13 = vpop.f32.mrf.mxu0 }
 0x185   :  { %285 = vst.msk [vmem:[%s548_s4 + $0x10] sm:$0xff] %vm282_vm1, %v315_v13 }
 0x186   :  { %v251_v14 = vpop.f32.mrf.mxu0 }
 0x187   :  { %283 = vst.msk [vmem:[%s548_s4] sm:$0xff] %vm282_vm1, %v251_v14 }
 0x188   :  { %v316_v26 = vpop.f32.mrf.mxu0  ;;  %v319_v27 = vpop.f32.mrf.mxu1 }
 0x189   :  { %286 = vst.msk [vmem:[%s548_s4 + $0x18] sm:$0xff] %vm282_vm1, %v316_v26  ;;  %289 = vst.msk [vmem:[%s548_s4 + $0x30] sm:$0xff] %vm282_vm1, %v319_v27 }
 0x18a   :  { %v254_v28 = vpop.f32.mrf.mxu0  ;;  %v267_v29 = vpop.f32.mrf.mxu1 }
 0x18b   :  { %284 = vst.msk [vmem:[%s548_s4 + $0x8] sm:$0xff] %vm282_vm1, %v254_v28  ;;  %287 = vst.msk [vmem:[%s548_s4 + $0x20] sm:$0xff] %vm282_vm1, %v267_v29 }
 0x18c   :  { %v320_v30 = vpop.f32.mrf.mxu1 }
 0x18d   :  { %290 = vst.msk [vmem:[%s548_s4 + $0x38] sm:$0xff] %vm282_vm1, %v320_v30 }
 0x18e   :  { %v270_v31 = vpop.f32.mrf.mxu1 }
 0x18f   :  { %288 = vst.msk [vmem:[%s548_s4 + $0x28] sm:$0xff] %vm282_vm1, %v270_v31 }

// kernel: transformer_forward.9
= control target key start
LH: loop header
LB: loop body
LE: loop exit
PB: predicated region body
PF: predicated region fallthrough
CT: control target
= control target key end

     0   :  { %s550_s12 = smov 0   ;;  %s552_s13 = smov 0   ;;  %s601_s0 = inlined_call_operand.vmem [shape: f32[8,8,32], index: 0, kind: input, shape index: {}]   ;;  %s602_s1 = inlined_call_operand.vmem [shape: f32[8,8,32], index: 1, kind: input, shape index: {}]   ;;  %s603_s2 = inlined_call_operand.vmem [shape: f32[8,8,32], index: 2, kind: input, shape index: {}]   ;;  %s604_s3 = inlined_call_operand.vmem [shape: f32[8,8,32], index: 3, kind: output, shape index: {}]  }
   0x1   :  { %s554_s14 = smov 0  }
   0x2 LB: > { %s25_s15 = sadd.s32 1, %s522_s13  ;;  %p449_p0 = scmp.ge.s32.totalorder %s526_s14, 1  ;;  %s526_s14 = sphi %s554_s14, %s13_s14   ;;  %s522_s13 = sphi %s552_s13, %s606_s13   ;;  %s518_s12 = sphi %s550_s12, %s605_s12  }
   0x3   : > { %p27_p1 = scmp.ge.s32.totalorder %s25_s15, 8  ;;  %p173_p2 = scmp.lt.s32.totalorder %s526_s14, 9 }
   0x5   : > { %s608_s15 = smov (%p27_p1, %s25_s15), 0  ;;  %p174_p3 = pnand %p449_p0, %p173_p2 }
   0x6   : > { %p209_p4 = scmp.lt.s32.totalorder (!%p174_p3), %s518_s12, 7 }
   0x7   : > { %177 = sbr.rel (%p174_p3) target bundleno = 734 (0x2de), region = 32 }
   0xc   : > { %v528_v0 = vmov 0.0   ;;  %vm529_vm0 = vmmov 0   ;;  %s610_s12 = smov (!%p209_p4, %s518_s12), 7  ;;  %vm238_vm1 = vcmask 261120   ;;  %vm286_vm2 = vcmask 64512  }
   0xd   : > { %462 = vmatprep.subr.bf16.mxu0 %v528_v0  ;;  %464 = vmatprep.mubr.msk.bf16.mxu0 %vm529_vm0, %v528_v0  ;;  %s568_s16 = sshll.u32 %s610_s12, 3  ;;  %vm302_vm3 = vcmask 1043456  }
   0xe   : > { %468 = vmatprep.subr.bf16.mxu1 %v528_v0  ;;  %470 = vmatprep.mubr.msk.bf16.mxu1 %vm529_vm0, %v528_v0  ;;  %s219_s19 = scalar_lea.vmem %s602_s1, %s568_s16  ;;  %s215_s22 = scalar_lea.vmem %s601_s0, %s568_s16 }
   0xf   : > { %v234_v1 = vld [vmem:[%s219_s19] sm:$0xff]  ;;  %s223_s25 = scalar_lea.vmem %s603_s2, %s568_s16  ;;  %s230_s28 = scalar_lea.vmem %s604_s3, %s568_s16 }
  0x10   : > { %v235_v2 = vpack.c.bf16 %v234_v1, %v234_v1  ;;  %v232_v4 = vld [vmem:[%s215_s22] sm:$0xff] }
  0x11   : > { %v233_v5 = vpack.c.bf16 %v232_v4, %v232_v4  ;;  %v236_v17 = vld [vmem:[%s223_s25] sm:$0xff] }
  0x12   : > { %v243_v3 = vsel %vm238_vm1, %v235_v2, 0  ;;  %v237_v18 = vpack.c.bf16 %v236_v17, %v236_v17 }
  0x13   : > { %463 = vmatpush3.bf16.xpose.msra.mxu0 %v243_v3 }
  0x14   : > { %v304_v19 = vsel %vm302_vm3, %v237_v18, 0 }
  0x15   : > { %469 = vmatpush3.bf16.msra.mxu1 %v304_v19 }
  0x1a   : > { %465 = vmatmul.mubr.msk.bf16.vlgmr.msra.gmra.mxu0 %vm238_vm1, %v233_v5 }
  0xda   : > { %v279_v6 = vpop.f32.mrf.mxu0 }
  0xdb   : > { %v285_v7 = vmul.f32 0.17677669, %v279_v6 }
  0xdc   : > { %v466_v8 = vpop.f32.mrf.mxu0 }
  0xdd   : > { %v287_v9 = vsel %vm286_vm2, %v285_v7, -inf }
  0xde   : > { %288 = vmax.xlane.f32.xlu0 %v287_v9  ;;  %v282_v10 = vpop.f32.mrf.mxu0 }
  0xe0   : > { %v467_v11 = vpop.f32.mrf.mxu0 }
 0x167   : > { %v289_v12 = vpop.xlane.xlu0 %288 }
 0x168   : > { %v290_v13 = vsub.f32 %v285_v7, %v289_v12 }
 0x16a   : > { %v291_v14 = vmul.f32 1.442695, %v290_v13 }
 0x16c   : > { %500 = vpow2.f32 %v291_v14 }
 0x179   : > { %v501_v15 = vpop.eup %500 }
 0x17a   : > { %v293_v16 = vsel %vm286_vm2, %v501_v15, 0.0 }
 0x17b   : > { %294 = vadd.xlane.f32.xlu0 %v293_v16 }
 0x204   : > { %v295_v20 = vpop.xlane.xlu0 %294 }
 0x205   : > { %502 = vrcp.f32 %v295_v20 }
 0x212   : > { %v503_v21 = vpop.eup %502 }
 0x213   : > { %v297_v22 = vmul.f32 %v503_v21, %v501_v15 }
 0x215   : > { %v298_v23 = vpack.c.bf16 %v297_v22, %v297_v22 }
 0x217   : > { %471 = vmatmul.mubr.msk.bf16.vlgmr.msra.gmra.mxu1 %vm286_vm2, %v298_v23 }
 0x2d7   : > { %v340_v24 = vpop.f32.mrf.mxu1 }
 0x2d8   : > { %346 = vst.msk [vmem:[%s230_s28] sm:$0xff] %vm238_vm1, %v340_v24 }
 0x2d9   : > { %v472_v25 = vpop.f32.mrf.mxu1 }
 0x2db   : > { %v343_v26 = vpop.f32.mrf.mxu1 }
 0x2dd   : > { %v473_v27 = vpop.f32.mrf.mxu1 }
 0x2de PF: > { %s13_s14 = sadd.s32 1, %s526_s14   ;;  %s605_s12 = smov %s522_s13 }
 0x2df   : > { %p10_p5 = scmp.ge.s32.totalorder %s13_s14, 10   ;;  %s606_s13 = smov %s608_s15 }
 0x2e1   :  { %12 = sbr.rel (!%p10_p5) target bundleno = 2 (0x2), region = 68 }

// kernel: transformer_forward.10
= control target key start
LH: loop header
LB: loop body
LE: loop exit
PB: predicated region body
PF: predicated region fallthrough
CT: control target
= control target key end

     0   :  { %vm53_vm0 = vcmask 261120   ;;  %s308_s1 = inlined_call_operand.vmem [shape: bf16[32,32], index: 1, kind: input, shape index: {}]   ;;  %s309_s0 = inlined_call_operand.vmem [shape: f32[64,32], index: 0, kind: input, shape index: {}]   ;;  %s310_s2 = inlined_call_operand.vmem [shape: f32[1,32], index: 2, kind: input, shape index: {}]   ;;  %s311_s3 = inlined_call_operand.vmem [shape: f32[64,32], index: 3, kind: input, shape index: {}]   ;;  %s312_s4 = inlined_call_operand.vmem [shape: f32[64,32], index: 4, kind: output, shape index: {}]  }
   0x1   :  { %v188_v0 = vld [vmem:[%s308_s1 + $0x8] sm:$0xff]   ;;  %v189_v1 = vld [vmem:[%s308_s1] sm:$0xff]   ;;  %v20_v7 = vld [vmem:[%s309_s0 + $0x10] sm:$0xff] }
   0x2   :  { %172 = vmatprep.subr.bf16.mxu0 %v188_v0  ;;  %184 = vmatprep.subr.bf16.mxu1 %v188_v0  ;;  %v18_v2 = vld [vmem:[%s309_s0] sm:$0xff]  ;;  %v19_v3 = vld [vmem:[%s309_s0 + $0x8] sm:$0xff]  ;;  %v21_v8 = vld [vmem:[%s309_s0 + $0x18] sm:$0xff] }
   0x3   :  { %v22_v4 = vld [vmem:[%s309_s0 + $0x20] sm:$0xff]  ;;  %173 = vmatpush3.bf16.msra.mxu0 %v188_v0  ;;  %186 = vmatpush3.bf16.msra.mxu1 %v188_v0  ;;  %v26_v5 = vpack.c.bf16 %v19_v3, %v18_v2  ;;  %v23_v6 = vld [vmem:[%s309_s0 + $0x28] sm:$0xff]  ;;  %v24_v10 = vld [vmem:[%s309_s0 + $0x30] sm:$0xff]  ;;  %v27_v12 = vpack.c.bf16 %v21_v8, %v20_v7 }
   0x4   :  { %174 = vmatprep.subr.bf16.mxu0 %v189_v1  ;;  %185 = vmatprep.subr.bf16.mxu1 %v189_v1  ;;  %v28_v9 = vpack.c.bf16 %v23_v6, %v22_v4  ;;  %v25_v11 = vld [vmem:[%s309_s0 + $0x38] sm:$0xff]  ;;  %v159_v14 = vld [vmem:[%s310_s2] ss:$0 sm:$0xff]  ;;  %v133_v16 = vld [vmem:[%s311_s3 + $0x10] sm:$0xff] }
   0x5   :  { %176 = vmatprep.mubr.msk.bf16.mxu0 %vm53_vm0, %v26_v5  ;;  %v29_v13 = vpack.c.bf16 %v25_v11, %v24_v10  ;;  %v137_v18 = vld [vmem:[%s311_s3 + $0x30] sm:$0xff]  ;;  %v131_v22 = vld [vmem:[%s311_s3] sm:$0xff]  ;;  %v134_v30 = vld [vmem:[%s311_s3 + $0x18] sm:$0xff] }
   0x6   :  { %180 = vmatprep.mubr.msk.bf16.mxu1 %vm53_vm0, %v28_v9  ;;  %v135_v24 = vld [vmem:[%s311_s3 + $0x20] sm:$0xff]  ;;  %v138_v32 = vld [vmem:[%s311_s3 + $0x38] sm:$0xff]  ;;  %v132_v38 = vld [vmem:[%s311_s3 + $0x8] sm:$0xff] }
   0x7   :  { %175 = vmatpush3.bf16.msra.mxu0 %v189_v1  ;;  %187 = vmatpush3.bf16.msra.mxu1 %v189_v1  ;;  %v136_v40 = vld [vmem:[%s311_s3 + $0x28] sm:$0xff] }
   0xa   :  { %177 = vmatmul.mubr.msk.bf16.vlgmr.msra.gmra.mxu0 %vm53_vm0, %v27_v12  ;;  %181 = vmatmul.mubr.msk.bf16.vlgmr.msra.gmra.mxu1 %vm53_vm0, %v29_v13 }
  0xca   :  { %v178_v15 = vpop.f32.mrf.mxu0  ;;  %v182_v17 = vpop.f32.mrf.mxu1 }
  0xcb   :  { %v109_v19 = vadd.f32 %v178_v15, %v159_v14  ;;  %v125_v20 = vadd.f32 %v182_v17, %v159_v14 }
  0xcc   :  { %v100_v21 = vpop.f32.mrf.mxu0  ;;  %v116_v23 = vpop.f32.mrf.mxu1 }
  0xcd   :  { %v141_v25 = vadd.f32 %v133_v16, %v109_v19  ;;  %v145_v26 = vadd.f32 %v137_v18, %v125_v20  ;;  %v101_v27 = vadd.f32 %v159_v14, %v100_v21  ;;  %v117_v28 = vadd.f32 %v159_v14, %v116_v23 }
  0xce   :  { %v179_v29 = vpop.f32.mrf.mxu0  ;;  %v183_v31 = vpop.f32.mrf.mxu1 }
  0xcf   :  { %149 = vst.msk [vmem:[%s312_s4 + $0x10] sm:$0xff] %vm53_vm0, %v141_v25  ;;  %153 = vst.msk [vmem:[%s312_s4 + $0x30] sm:$0xff] %vm53_vm0, %v145_v26  ;;  %v139_v33 = vadd.f32 %v131_v22, %v101_v27  ;;  %v143_v34 = vadd.f32 %v135_v24, %v117_v28  ;;  %v112_v35 = vadd.f32 %v179_v29, %v159_v14 }
  0xd0   :  { %v128_v36 = vadd.f32 %v183_v31, %v159_v14  ;;  %v103_v37 = vpop.f32.mrf.mxu0  ;;  %v119_v39 = vpop.f32.mrf.mxu1 }
  0xd1   :  { %147 = vst.msk [vmem:[%s312_s4] sm:$0xff] %vm53_vm0, %v139_v33  ;;  %151 = vst.msk [vmem:[%s312_s4 + $0x20] sm:$0xff] %vm53_vm0, %v143_v34  ;;  %v142_v41 = vadd.f32 %v134_v30, %v112_v35  ;;  %v104_v43 = vadd.f32 %v159_v14, %v103_v37  ;;  %v120_v44 = vadd.f32 %v159_v14, %v119_v39 }
  0xd2   :  { %v146_v42 = vadd.f32 %v138_v32, %v128_v36 }
  0xd3   :  { %150 = vst.msk [vmem:[%s312_s4 + $0x18] sm:$0xff] %vm53_vm0, %v142_v41  ;;  %v140_v45 = vadd.f32 %v132_v38, %v104_v43  ;;  %v144_v46 = vadd.f32 %v136_v40, %v120_v44 }
  0xd4   :  { %154 = vst.msk [vmem:[%s312_s4 + $0x38] sm:$0xff] %vm53_vm0, %v146_v42 }
  0xd5   :  { %148 = vst.msk [vmem:[%s312_s4 + $0x8] sm:$0xff] %vm53_vm0, %v140_v45  ;;  %152 = vst.msk [vmem:[%s312_s4 + $0x28] sm:$0xff] %vm53_vm0, %v144_v46 }

// kernel: transformer_forward.15
= control target key start
LH: loop header
LB: loop body
LE: loop exit
PB: predicated region body
PF: predicated region fallthrough
CT: control target
= control target key end

     0   :  { %vm38_vm0 = vcmask 261120   ;;  %s883_s0 = inlined_call_operand.vmem [shape: f32[64,32], index: 0, kind: input, shape index: {}]   ;;  %s884_s1 = inlined_call_operand.vmem [shape: f32[1,32], index: 1, kind: input, shape index: {}]   ;;  %s885_s2 = inlined_call_operand.vmem [shape: f32[1,32], index: 2, kind: input, shape index: {}]   ;;  %s886_s3 = inlined_call_operand.vmem [shape: bf16[32,64], index: 3, kind: input, shape index: {}]   ;;  %s887_s4 = inlined_call_operand.vmem [shape: f32[1,64], index: 4, kind: input, shape index: {}]   ;;  %s888_s5 = inlined_call_operand.vmem [shape: bf16[64,32], index: 5, kind: input, shape index: {}]   ;;  %s889_s6 = inlined_call_operand.vmem [shape: f32[1,32], index: 6, kind: input, shape index: {}]   ;;  %s890_s7 = inlined_call_operand.hbm [shape: f32[64,32], index: 7, kind: output, shape index: {}]  }
   0x1   :  { %v693_v0 = vld [vmem:[%s883_s0 + $0x10] sm:$0xff]  ;;  %v698_v1 = vld [vmem:[%s883_s0] sm:$0xff]  ;;  %v703_v2 = vld [vmem:[%s883_s0 + $0x18] sm:$0xff] }
   0x2   :  { %v45_v3 = vsel %vm38_vm0, %v693_v0, 0.0  ;;  %v39_v4 = vsel %vm38_vm0, %v698_v1, 0.0  ;;  %v712_v5 = vld [vmem:[%s883_s0 + $0x8] sm:$0xff]  ;;  %v48_v6 = vsel %vm38_vm0, %v703_v2, 0.0  ;;  %v63_v9 = vmul.f32 %v698_v1, %v698_v1 }
   0x3   :  { %46 = vadd.xlane.f32.xlu1 %v45_v3  ;;  %40 = vadd.xlane.f32.xlu0 %v39_v4  ;;  %v42_v7 = vsel %vm38_vm0, %v712_v5, 0.0  ;;  %v64_v8 = vmul.f32 %v712_v5, %v712_v5  ;;  %v66_v12 = vmul.f32 %v703_v2, %v703_v2  ;;  %v65_v13 = vmul.f32 %v693_v0, %v693_v0 }
   0x4   :  { %v71_v11 = vsel %vm38_vm0, %v63_v9, 0.0 }
   0x5   :  { %v74_v10 = vsel %vm38_vm0, %v64_v8, 0.0 }
   0x7   :  { %49 = vadd.xlane.f32.xlu1 %v48_v6  ;;  %43 = vadd.xlane.f32.xlu0 %v42_v7 }
   0x8   :  { %12 = vsyncpa [#allocation3], 0  ;;  %v80_v14 = vsel %vm38_vm0, %v66_v12, 0.0  ;;  %v77_v15 = vsel %vm38_vm0, %v65_v13, 0.0  ;;  %v733_v16 = vld [vmem:[%s883_s0 + $0x28] sm:$0xff]  ;;  %v738_v17 = vld [vmem:[%s883_s0 + $0x20] sm:$0xff] }
   0x9   :  { %v54_v18 = vsel %vm38_vm0, %v733_v16, 0.0  ;;  %v51_v19 = vsel %vm38_vm0, %v738_v17, 0.0  ;;  %v747_v20 = vld [vmem:[%s883_s0 + $0x38] sm:$0xff]  ;;  %v752_v21 = vld [vmem:[%s883_s0 + $0x30] sm:$0xff]  ;;  %v68_v24 = vmul.f32 %v733_v16, %v733_v16  ;;  %v67_v25 = vmul.f32 %v738_v17, %v738_v17  ;;  %v571_v32 = vld [vmem:[%s886_s3 + $0x8] sm:$0xff]  }
   0xa   :  { %v60_v22 = vsel %vm38_vm0, %v747_v20, 0.0  ;;  %v57_v23 = vsel %vm38_vm0, %v752_v21, 0.0  ;;  %v70_v28 = vmul.f32 %v747_v20, %v747_v20  ;;  %v69_v29 = vmul.f32 %v752_v21, %v752_v21  ;;  %540 = vmatprep.subr.bf16.mxu0 %v571_v32  ;;  %v572_v33 = vld [vmem:[%s886_s3] sm:$0xff]  }
   0xb   :  { %75 = vadd.xlane.f32.xlu1 %v74_v10  ;;  %72 = vadd.xlane.f32.xlu0 %v71_v11  ;;  %v86_v26 = vsel %vm38_vm0, %v68_v24, 0.0  ;;  %v83_v27 = vsel %vm38_vm0, %v67_v25, 0.0  ;;  %vm398_vm1 = vcmask 523264  }
   0xc   :  { %v92_v30 = vsel %vm38_vm0, %v70_v28, 0.0  ;;  %v89_v31 = vsel %vm38_vm0, %v69_v29, 0.0  ;;  %541 = vmatpush3.bf16.msra.mxu0 %v571_v32 }
   0xd   :  { %542 = vmatprep.subr.bf16.mxu0 %v572_v33 }
   0xf   :  { %81 = vadd.xlane.f32.xlu1 %v80_v14  ;;  %78 = vadd.xlane.f32.xlu0 %v77_v15 }
  0x10   :  { %543 = vmatpush3.bf16.msra.mxu0 %v572_v33 }
  0x13   :  { %55 = vadd.xlane.f32.xlu1 %v54_v18  ;;  %52 = vadd.xlane.f32.xlu0 %v51_v19 }
  0x17   :  { %61 = vadd.xlane.f32.xlu1 %v60_v22  ;;  %58 = vadd.xlane.f32.xlu0 %v57_v23 }
  0x1b   :  { %87 = vadd.xlane.f32.xlu1 %v86_v26  ;;  %84 = vadd.xlane.f32.xlu0 %v83_v27 }
  0x1f   :  { %93 = vadd.xlane.f32.xlu1 %v92_v30  ;;  %90 = vadd.xlane.f32.xlu0 %v89_v31 }
  0x8c   :  { %v47_v34 = vpop.xlane.xlu1 %46  ;;  %v41_v35 = vpop.xlane.xlu0 %40 }
  0x8d   :  { %v776_v38 = vmul.f32 0.03125, %v41_v35  ;;  %v780_v40 = vmul.f32 0.03125, %v47_v34 }
  0x8f   :  { %v111_v44 = vmul.f32 %v776_v38, %v776_v38  ;;  %v113_v50 = vmul.f32 %v780_v40, %v780_v40  ;;  %v135_v35 = vsub.f32 %v698_v1, %v776_v38 }
  0x90   :  { %v50_v36 = vpop.xlane.xlu1 %49  ;;  %v44_v37 = vpop.xlane.xlu0 %43 }
  0x91   :  { %v778_v39 = vmul.f32 0.03125, %v44_v37  ;;  %v782_v41 = vmul.f32 0.03125, %v50_v36 }
  0x93   :  { %v112_v45 = vmul.f32 %v778_v39, %v778_v39  ;;  %v114_v51 = vmul.f32 %v782_v41, %v782_v41  ;;  %v136_v36 = vsub.f32 %v712_v5, %v778_v39  ;;  %v509_v39 = vld [vmem:[%s885_s2] ss:$0 sm:$0xff] }
  0x94   :  { %v76_v42 = vpop.xlane.xlu1 %75  ;;  %v73_v43 = vpop.xlane.xlu0 %72 }
  0x95   :  { %v104_v46 = vmul.f32 0.03125, %v76_v42  ;;  %v103_v47 = vmul.f32 0.03125, %v73_v43 }
  0x97   :  { %v120_v48 = vsub.f32 %v104_v46, %v112_v45  ;;  %v119_v49 = vsub.f32 %v103_v47, %v111_v44  ;;  %v508_v46 = vld [vmem:[%s884_s1] ss:$0 sm:$0xff] }
  0x98   :  { %v82_v52 = vpop.xlane.xlu1 %81  ;;  %v79_v53 = vpop.xlane.xlu0 %78 }
  0x99   :  { %v128_v54 = vmax.f32 %v120_v48, 0.0  ;;  %v127_v55 = vmax.f32 %v119_v49, 0.0  ;;  %v106_v56 = vmul.f32 0.03125, %v82_v52  ;;  %v105_v57 = vmul.f32 0.03125, %v79_v53 }
  0x9a   :  { %v138_v49 = vsub.f32 %v703_v2, %v782_v41  ;;  %v137_v52 = vsub.f32 %v693_v0, %v780_v40 }
  0x9b   :  { %v144_v58 = vadd.f32 1e-05, %v128_v54  ;;  %v143_v59 = vadd.f32 1e-05, %v127_v55  ;;  %v122_v60 = vsub.f32 %v106_v56, %v114_v51  ;;  %v121_v61 = vsub.f32 %v105_v57, %v113_v50 }
  0x9c   :  { %v56_v62 = vpop.xlane.xlu1 %55  ;;  %v53_v63 = vpop.xlane.xlu0 %52 }
  0x9d   :  { %577 = vrsqrt.f32 %v144_v58  ;;  %v130_v3 = vmax.f32 %v122_v60, 0.0  ;;  %v129_v4 = vmax.f32 %v121_v61, 0.0  ;;  %v792_v10 = vmul.f32 0.03125, %v56_v62 }
  0x9e   :  { %579 = vrsqrt.f32 %v143_v59  ;;  %v794_v11 = vmul.f32 0.03125, %v53_v63 }
  0x9f   :  { %v146_v6 = vadd.f32 1e-05, %v130_v3  ;;  %v145_v7 = vadd.f32 1e-05, %v129_v4  ;;  %v116_v18 = vmul.f32 %v792_v10, %v792_v10 }
  0xa0   :  { %v62_v8 = vpop.xlane.xlu1 %61  ;;  %v59_v9 = vpop.xlane.xlu0 %58  ;;  %v115_v19 = vmul.f32 %v794_v11, %v794_v11 }
  0xa1   :  { %581 = vrsqrt.f32 %v146_v6  ;;  %v796_v12 = vmul.f32 0.03125, %v62_v8  ;;  %v798_v13 = vmul.f32 0.03125, %v59_v9  ;;  %v140_v6 = vsub.f32 %v733_v16, %v792_v10 }
  0xa2   :  { %583 = vrsqrt.f32 %v145_v7  ;;  %v139_v8 = vsub.f32 %v738_v17, %v794_v11 }
  0xa3   :  { %v118_v26 = vmul.f32 %v796_v12, %v796_v12  ;;  %v117_v27 = vmul.f32 %v798_v13, %v798_v13 }
  0xa4   :  { %v88_v14 = vpop.xlane.xlu1 %87  ;;  %v85_v15 = vpop.xlane.xlu0 %84 }
  0xa5   :  { %v108_v22 = vmul.f32 0.03125, %v88_v14  ;;  %v107_v23 = vmul.f32 0.03125, %v85_v15 }
  0xa7   :  { %v124_v24 = vsub.f32 %v108_v22, %v116_v18  ;;  %v123_v25 = vsub.f32 %v107_v23, %v115_v19  ;;  %v142_v18 = vsub.f32 %v747_v20, %v796_v12  ;;  %v141_v23 = vsub.f32 %v752_v21, %v798_v13  ;;  %v573_v12 = vld [vmem:[%s888_s5 + $0x18] sm:$0xff]   ;;  %v574_v13 = vld [vmem:[%s888_s5 + $0x10] sm:$0xff]  }
  0xa8   :  { %v94_v28 = vpop.xlane.xlu1 %93  ;;  %v91_v29 = vpop.xlane.xlu0 %90  ;;  %552 = vmatprep.subr.bf16.mxu1 %v573_v12 }
  0xa9   :  { %v132_v30 = vmax.f32 %v124_v24, 0.0  ;;  %v131_v31 = vmax.f32 %v123_v25, 0.0  ;;  %v110_v32 = vmul.f32 0.03125, %v94_v28  ;;  %v109_v33 = vmul.f32 0.03125, %v91_v29  ;;  %553 = vmatpush3.bf16.msra.mxu1 %v573_v12 }
  0xaa   :  { %v578_v34 = vpop.eup %577  ;;  %554 = vmatprep.subr.bf16.mxu1 %v574_v13 }
  0xab   :  { %v580_v37 = vpop.eup %579  ;;  %v148_v42 = vadd.f32 1e-05, %v132_v30  ;;  %v147_v43 = vadd.f32 1e-05, %v131_v31  ;;  %v126_v44 = vsub.f32 %v110_v32, %v118_v26  ;;  %v125_v45 = vsub.f32 %v109_v33, %v117_v27 }
  0xac   :  { %v159_v47 = vmul.f32 %v580_v37, %v135_v35  ;;  %v160_v48 = vmul.f32 %v578_v34, %v136_v36  ;;  %v575_v34 = vld [vmem:[%s888_s5 + $0x8] sm:$0xff]   ;;  %v576_v35 = vld [vmem:[%s888_s5] sm:$0xff]  }
  0xad   :  { %585 = vrsqrt.f32 %v148_v42  ;;  %v134_v50 = vmax.f32 %v126_v44, 0.0  ;;  %v133_v38 = vmax.f32 %v125_v45, 0.0  ;;  %555 = vmatpush3.bf16.msra.mxu1 %v574_v13  ;;  %v510_v36 = vld [vmem:[%s887_s4] ss:$0 sm:$0xff] }
  0xae   :  { %v582_v51 = vpop.eup %581  ;;  %587 = vrsqrt.f32 %v147_v43  ;;  %v173_v53 = vmul.f32 %v508_v46, %v159_v47  ;;  %v174_v54 = vmul.f32 %v508_v46, %v160_v48  ;;  %556 = vmatprep.subr.bf16.mxu1 %v575_v34 }
  0xaf   :  { %v584_v55 = vpop.eup %583  ;;  %v150_v56 = vadd.f32 1e-05, %v134_v50  ;;  %v149_v57 = vadd.f32 1e-05, %v133_v38  ;;  %v162_v58 = vmul.f32 %v582_v51, %v138_v49 }
  0xb0   :  { %v187_v59 = vadd.f32 %v509_v39, %v173_v53  ;;  %v188_v41 = vadd.f32 %v509_v39, %v174_v54  ;;  %v161_v60 = vmul.f32 %v584_v55, %v137_v52 }
  0xb1   :  { %589 = vrsqrt.f32 %v150_v56  ;;  %v176_v61 = vmul.f32 %v508_v46, %v162_v58  ;;  %557 = vmatpush3.bf16.msra.mxu1 %v575_v34 }
  0xb2   :  { %591 = vrsqrt.f32 %v149_v57  ;;  %v195_v62 = vpack.c.bf16 %v188_v41, %v187_v59  ;;  %v175_v63 = vmul.f32 %v508_v46, %v161_v60  ;;  %558 = vmatprep.subr.bf16.mxu1 %v576_v35 }
  0xb3   :  { %v190_v3 = vadd.f32 %v509_v39, %v176_v61 }
  0xb4   :  { %544 = vmatprep.mubr.msk.bf16.mxu0 %vm38_vm0, %v195_v62  ;;  %v189_v4 = vadd.f32 %v509_v39, %v175_v63 }
  0xb5   :  { %559 = vmatpush3.bf16.msra.mxu1 %v576_v35 }
  0xb6   :  { %v196_v40 = vpack.c.bf16 %v190_v3, %v189_v4 }
  0xb8   :  { %545 = vmatmul.mubr.msk.bf16.vlgmr.msra.gmra.mxu0 %vm38_vm0, %v196_v40 }
  0xba   :  { %v586_v7 = vpop.eup %585 }
  0xbb   :  { %v588_v9 = vpop.eup %587  ;;  %v164_v14 = vmul.f32 %v586_v7, %v140_v6 }
  0xbc   :  { %v163_v15 = vmul.f32 %v588_v9, %v139_v8 }
  0xbd   :  { %v178_v19 = vmul.f32 %v508_v46, %v164_v14 }
  0xbe   :  { %v590_v22 = vpop.eup %589  ;;  %v177_v24 = vmul.f32 %v508_v46, %v163_v15 }
  0xbf   :  { %v592_v25 = vpop.eup %591  ;;  %v192_v26 = vadd.f32 %v509_v39, %v178_v19  ;;  %v166_v27 = vmul.f32 %v590_v22, %v142_v18 }
  0xc0   :  { %v191_v10 = vadd.f32 %v509_v39, %v177_v24  ;;  %v165_v28 = vmul.f32 %v592_v25, %v141_v23 }
  0xc1   :  { %v180_v29 = vmul.f32 %v508_v46, %v166_v27 }
  0xc2   :  { %v197_v30 = vpack.c.bf16 %v192_v26, %v191_v10  ;;  %v179_v11 = vmul.f32 %v508_v46, %v165_v28 }
  0xc3   :  { %v194_v31 = vadd.f32 %v509_v39, %v180_v29 }
  0xc4   :  { %548 = vmatprep.mubr.msk.bf16.mxu0 %vm38_vm0, %v197_v30  ;;  %v193_v32 = vadd.f32 %v509_v39, %v179_v11 }
  0xc6   :  { %v198_v33 = vpack.c.bf16 %v194_v31, %v193_v32 }
  0xc8   :  { %549 = vmatmul.mubr.msk.bf16.gmra.mxu0 %vm38_vm0, %v198_v33 }
 0x178   :  { %v546_v37 = vpop.f32.mrf.mxu0 }
 0x179   :  { %v849_v42 = vadd.f32 %v546_v37, %v510_v36 }
 0x17a   :  { %v268_v43 = vpop.f32.mrf.mxu0 }
 0x17b   :  { %v301_v44 = vsub.f32 0.0, %v849_v42  ;;  %v269_v45 = vadd.f32 %v510_v36, %v268_v43 }
 0x17c   :  { %v547_v46 = vpop.f32.mrf.mxu0 }
 0x17d   :  { %v311_v47 = vmul.f32 1.442695, %v301_v44  ;;  %v299_v48 = vsub.f32 0.0, %v269_v45  ;;  %v280_v49 = vadd.f32 %v547_v46, %v510_v36 }
 0x17e   :  { %v271_v50 = vpop.f32.mrf.mxu0 }
 0x17f   :  { %593 = vpow2.f32 %v311_v47  ;;  %v307_v38 = vmul.f32 1.442695, %v299_v48  ;;  %v302_v39 = vsub.f32 0.0, %v280_v49  ;;  %v272_v51 = vadd.f32 %v510_v36, %v271_v50 }
 0x181   :  { %595 = vpow2.f32 %v307_v38  ;;  %v313_v52 = vmul.f32 1.442695, %v302_v39  ;;  %v300_v53 = vsub.f32 0.0, %v272_v51 }
 0x183   :  { %597 = vpow2.f32 %v313_v52  ;;  %v309_v54 = vmul.f32 1.442695, %v300_v53 }
 0x185   :  { %599 = vpow2.f32 %v309_v54 }
 0x188   :  { %v550_v55 = vpop.f32.mrf.mxu0 }
 0x189   :  { %v852_v56 = vadd.f32 %v550_v55, %v510_v36 }
 0x18a   :  { %v284_v57 = vpop.f32.mrf.mxu0 }
 0x18b   :  { %v305_v58 = vsub.f32 0.0, %v852_v56  ;;  %v285_v59 = vadd.f32 %v510_v36, %v284_v57 }
 0x18c   :  { %v594_v41 = vpop.eup %593  ;;  %v551_v60 = vpop.f32.mrf.mxu0 }
 0x18d   :  { %v325_v61 = vadd.f32 1.0, %v594_v41  ;;  %v319_v62 = vmul.f32 1.442695, %v305_v58  ;;  %v303_v63 = vsub.f32 0.0, %v285_v59  ;;  %v296_v3 = vadd.f32 %v551_v60, %v510_v36 }
 0x18e   :  { %v596_v4 = vpop.eup %595  ;;  %v287_v40 = vpop.f32.mrf.mxu0 }
 0x18f   :  { %601 = vrcp.f32 %v325_v61  ;;  %v323_v6 = vadd.f32 1.0, %v596_v4  ;;  %v315_v7 = vmul.f32 1.442695, %v303_v63  ;;  %v306_v8 = vsub.f32 0.0, %v296_v3 }
 0x190   :  { %v598_v9 = vpop.eup %597  ;;  %603 = vpow2.f32 %v319_v62  ;;  %v288_v14 = vadd.f32 %v510_v36, %v287_v40 }
 0x191   :  { %605 = vrcp.f32 %v323_v6  ;;  %v326_v15 = vadd.f32 1.0, %v598_v9  ;;  %v321_v18 = vmul.f32 1.442695, %v306_v8 }
 0x192   :  { %v600_v19 = vpop.eup %599  ;;  %607 = vpow2.f32 %v315_v7  ;;  %v304_v22 = vsub.f32 0.0, %v288_v14 }
 0x193   :  { %609 = vrcp.f32 %v326_v15  ;;  %v324_v23 = vadd.f32 1.0, %v600_v19 }
 0x194   :  { %611 = vpow2.f32 %v321_v18  ;;  %v317_v24 = vmul.f32 1.442695, %v304_v22 }
 0x195   :  { %613 = vrcp.f32 %v324_v23 }
 0x196   :  { %615 = vpow2.f32 %v317_v24 }
 0x19c   :  { %v602_v25 = vpop.eup %601 }
 0x19d   :  { %v604_v26 = vpop.eup %603  ;;  %v349_v35 = vmul.f32 %v602_v25, %v849_v42 }
 0x19e   :  { %v606_v27 = vpop.eup %605  ;;  %v329_v11 = vadd.f32 1.0, %v604_v26 }
 0x19f   :  { %v608_v10 = vpop.eup %607  ;;  %v347_v13 = vmul.f32 %v606_v27, %v269_v45 }
 0x1a0   :  { %v610_v28 = vpop.eup %609  ;;  %v327_v29 = vadd.f32 1.0, %v608_v10 }
 0x1a1   :  { %v612_v30 = vpop.eup %611  ;;  %v350_v32 = vmul.f32 %v610_v28, %v280_v49 }
 0x1a2   :  { %v614_v31 = vpop.eup %613  ;;  %v330_v33 = vadd.f32 1.0, %v612_v30  ;;  %617 = vrcp.f32 %v327_v29 }
 0x1a3   :  { %v616_v12 = vpop.eup %615  ;;  %v348_v34 = vmul.f32 %v614_v31, %v272_v51  ;;  %v356_v43 = vpack.c.bf16 %v350_v32, %v349_v35  ;;  %v517_v51 = vld [vmem:[%s889_s6] ss:$0 sm:$0xff]  ;;  %s647_s6 = smov [#allocation2]  }
 0x1a4   :  { %619 = vrcp.f32 %v330_v33  ;;  %v328_v36 = vadd.f32 1.0, %v616_v12  ;;  %s497_s8 = sshll.u32 %s647_s6, 4  ;;  %s498_s8 = int_to_ptr.vmem [resolvable:$true] %s497_s8 }
 0x1a5   :  { %621 = vrcp.f32 %v329_v11  ;;  %v355_v37 = vpack.c.bf16 %v348_v34, %v347_v13  ;;  %s625_s9 = scalar_lea.vmem %s498_s8, 1024  ;;  %p630_p1 = scmp.lt.s32.totalorder %s498_s8, %s498_s8 }
 0x1a6   :  { %623 = vrcp.f32 %v328_v36  ;;  %p626_p0 = scmp.ne.s32.totalorder %s498_s8, %s625_s9  ;;  %p631_p2 = scmp.lt.s32.totalorder %s625_s9, %s625_s9 }
 0x1a7   :  { %560 = vmatprep.mubr.msk.bf16.mxu1 %vm398_vm1, %v355_v37 }
 0x1a8   :  { %561 = vmatmul.mubr.msk.bf16.vlgmr.msra.gmra.mxu1 %vm398_vm1, %v356_v43  ;;  %p632_p3 = por %p631_p2, %p630_p1 }
 0x1aa   :  { %p633_p4 = pnand %p632_p3, %p626_p0 }
 0x1af   :  { %v618_v44 = vpop.eup %617 }
 0x1b0   :  { %v351_v49 = vmul.f32 %v618_v44, %v285_v59 }
 0x1b1   :  { %v620_v46 = vpop.eup %619 }
 0x1b2   :  { %v622_v47 = vpop.eup %621  ;;  %v354_v45 = vmul.f32 %v620_v46, %v296_v3 }
 0x1b3   :  { %v624_v48 = vpop.eup %623  ;;  %v353_v42 = vmul.f32 %v622_v47, %v852_v56 }
 0x1b4   :  { %v352_v50 = vmul.f32 %v624_v48, %v288_v14 }
 0x1b5   :  { %v358_v39 = vpack.c.bf16 %v354_v45, %v353_v42 }
 0x1b6   :  { %v357_v38 = vpack.c.bf16 %v352_v50, %v351_v49 }
 0x1b8   :  { %564 = vmatprep.mubr.msk.bf16.mxu1 %vm398_vm1, %v357_v38 }
 0x1b9   :  { %565 = vmatmul.mubr.msk.bf16.gmra.mxu1 %vm398_vm1, %v358_v39 }
 0x268   :  { %v562_v52 = vpop.f32.mrf.mxu1 }
 0x269   :  { %v454_v53 = vadd.f32 %v562_v52, %v517_v51 }
 0x26a   :  { %v445_v54 = vpop.f32.mrf.mxu1 }
 0x26b   :  { %v478_v55 = vadd.f32 %v454_v53, %v693_v0  ;;  %v446_v57 = vadd.f32 %v517_v51, %v445_v54 }
 0x26c   :  { %v563_v58 = vpop.f32.mrf.mxu1 }
 0x26d   :  { %486 = vst.msk [vmem:[#allocation2 + $0x10] sm:$0xff] %vm38_vm0, %v478_v55  ;;  %v476_v56 = vadd.f32 %v446_v57, %v698_v1  ;;  %v457_v59 = vadd.f32 %v563_v58, %v517_v51 }
 0x26e   :  { %v448_v41 = vpop.f32.mrf.mxu1 }
 0x26f   :  { %484 = vst.msk [vmem:[#allocation2] sm:$0xff] %vm38_vm0, %v476_v56  ;;  %v479_v60 = vadd.f32 %v457_v59, %v703_v2  ;;  %v449_v61 = vadd.f32 %v517_v51, %v448_v41 }
 0x271   :  { %487 = vst.msk [vmem:[#allocation2 + $0x18] sm:$0xff] %vm38_vm0, %v479_v60  ;;  %v477_v62 = vadd.f32 %v449_v61, %v712_v5 }
 0x273   :  { %485 = vst.msk [vmem:[#allocation2 + $0x8] sm:$0xff] %vm38_vm0, %v477_v62 }
 0x279   :  { %v566_v0 = vpop.f32.mrf.mxu1 }
 0x27a   :  { %v470_v63 = vadd.f32 %v566_v0, %v517_v51 }
 0x27b   :  { %v461_v3 = vpop.f32.mrf.mxu1 }
 0x27c   :  { %v482_v4 = vadd.f32 %v470_v63, %v752_v21  ;;  %v462_v40 = vadd.f32 %v517_v51, %v461_v3 }
 0x27d   :  { %v567_v1 = vpop.f32.mrf.mxu1 }
 0x27e   :  { %490 = vst.msk [vmem:[#allocation2 + $0x30] sm:$0xff] %vm38_vm0, %v482_v4  ;;  %v480_v6 = vadd.f32 %v462_v40, %v738_v17  ;;  %v473_v7 = vadd.f32 %v567_v1, %v517_v51 }
 0x27f   :  { %v464_v2 = vpop.f32.mrf.mxu1 }
 0x280   :  { %488 = vst.msk [vmem:[#allocation2 + $0x20] sm:$0xff] %vm38_vm0, %v480_v6  ;;  %v483_v5 = vadd.f32 %v473_v7, %v747_v20  ;;  %v465_v8 = vadd.f32 %v517_v51, %v464_v2 }
 0x282   :  { %491 = vst.msk [vmem:[#allocation2 + $0x38] sm:$0xff] %vm38_vm0, %v483_v5  ;;  %v481_v21 = vadd.f32 %v465_v8, %v733_v16 }
 0x284   :  { %489 = vst.msk [vmem:[#allocation2 + $0x28] sm:$0xff] %vm38_vm0, %v481_v21 }
 0x285   :  { %636 = shalt.err (!%p633_p4)
}
 0x286   :  { %s648_s10 = smov 128   ;;  %s649_s11 = smov 8  }
 0x287   :  { %503 = dma.vmem_to_hbm [thread:$0]  %s498_s8, 1024, %s890_s7, [#allocation3], %s648_s10, %s648_s10, %s649_s11  }
 0x288   :  { %645 = dma.done.wait [#allocation3], 1024  }
 0x289   :  { %646 = vsyncadd [#allocation3], 4294966272 }
 0x28a   :  { %507 = vsyncpa [#allocation3], 1 }

// kernel: transformer_forward.11
= control target key start
LH: loop header
LB: loop body
LE: loop exit
PB: predicated region body
PF: predicated region fallthrough
CT: control target
= control target key end

     0   :  { %vm37_vm0 = vcmask 261120   ;;  %vm397_vm1 = vcmask 523264   ;;  %s863_s0 = inlined_call_operand.vmem [shape: f32[64,32], index: 0, kind: input, shape index: {}]   ;;  %s864_s3 = inlined_call_operand.vmem [shape: bf16[32,64], index: 3, kind: input, shape index: {}]   ;;  %s865_s1 = inlined_call_operand.vmem [shape: f32[1,32], index: 1, kind: input, shape index: {}]   ;;  %s866_s2 = inlined_call_operand.vmem [shape: f32[1,32], index: 2, kind: input, shape index: {}]   ;;  %s867_s5 = inlined_call_operand.vmem [shape: bf16[64,32], index: 5, kind: input, shape index: {}]   ;;  %s868_s4 = inlined_call_operand.vmem [shape: f32[1,64], index: 4, kind: input, shape index: {}]   ;;  %s869_s6 = inlined_call_operand.vmem [shape: f32[1,32], index: 6, kind: input, shape index: {}]   ;;  %s870_s7 = inlined_call_operand.vmem [shape: f32[64,32], index: 7, kind: output, shape index: {}]  }
   0x1   :  { %v652_v0 = vld [vmem:[%s863_s0 + $0x10] sm:$0xff]  ;;  %v657_v1 = vld [vmem:[%s863_s0] sm:$0xff]  ;;  %v662_v2 = vld [vmem:[%s863_s0 + $0x18] sm:$0xff] }
   0x2   :  { %v44_v3 = vsel %vm37_vm0, %v652_v0, 0.0  ;;  %v38_v4 = vsel %vm37_vm0, %v657_v1, 0.0  ;;  %v671_v5 = vld [vmem:[%s863_s0 + $0x8] sm:$0xff]  ;;  %v47_v6 = vsel %vm37_vm0, %v662_v2, 0.0  ;;  %v62_v9 = vmul.f32 %v657_v1, %v657_v1  ;;  %v697_v17 = vld [vmem:[%s863_s0 + $0x20] sm:$0xff]  ;;  %v706_v20 = vld [vmem:[%s863_s0 + $0x38] sm:$0xff] }
   0x3   :  { %45 = vadd.xlane.f32.xlu1 %v44_v3  ;;  %39 = vadd.xlane.f32.xlu0 %v38_v4  ;;  %v41_v7 = vsel %vm37_vm0, %v671_v5, 0.0  ;;  %v63_v8 = vmul.f32 %v671_v5, %v671_v5  ;;  %v65_v12 = vmul.f32 %v662_v2, %v662_v2  ;;  %v64_v13 = vmul.f32 %v652_v0, %v652_v0  ;;  %v692_v16 = vld [vmem:[%s863_s0 + $0x28] sm:$0xff]  ;;  %v711_v21 = vld [vmem:[%s863_s0 + $0x30] sm:$0xff]  ;;  %v556_v33 = vld [vmem:[%s864_s3] sm:$0xff]  }
   0x4   :  { %v70_v11 = vsel %vm37_vm0, %v62_v9, 0.0  ;;  %v53_v18 = vsel %vm37_vm0, %v692_v16, 0.0  ;;  %v50_v19 = vsel %vm37_vm0, %v697_v17, 0.0  ;;  %v59_v22 = vsel %vm37_vm0, %v706_v20, 0.0  ;;  %v555_v32 = vld [vmem:[%s864_s3 + $0x8] sm:$0xff]  }
   0x5   :  { %v73_v10 = vsel %vm37_vm0, %v63_v8, 0.0  ;;  %v79_v14 = vsel %vm37_vm0, %v65_v12, 0.0  ;;  %v76_v15 = vsel %vm37_vm0, %v64_v13, 0.0  ;;  %v56_v23 = vsel %vm37_vm0, %v711_v21, 0.0  ;;  %527 = vmatprep.subr.bf16.mxu0 %v555_v32 }
   0x6   :  { %v67_v24 = vmul.f32 %v692_v16, %v692_v16  ;;  %v66_v25 = vmul.f32 %v697_v17, %v697_v17  ;;  %v69_v28 = vmul.f32 %v706_v20, %v706_v20  ;;  %v68_v29 = vmul.f32 %v711_v21, %v711_v21  ;;  %528 = vmatpush3.bf16.msra.mxu0 %v555_v32 }
   0x7   :  { %48 = vadd.xlane.f32.xlu1 %v47_v6  ;;  %42 = vadd.xlane.f32.xlu0 %v41_v7 }
   0x8   :  { %v85_v26 = vsel %vm37_vm0, %v67_v24, 0.0  ;;  %v82_v27 = vsel %vm37_vm0, %v66_v25, 0.0  ;;  %v91_v30 = vsel %vm37_vm0, %v69_v28, 0.0  ;;  %v88_v31 = vsel %vm37_vm0, %v68_v29, 0.0  ;;  %529 = vmatprep.subr.bf16.mxu0 %v556_v33 }
   0xa   :  { %530 = vmatpush3.bf16.msra.mxu0 %v556_v33 }
   0xb   :  { %74 = vadd.xlane.f32.xlu1 %v73_v10  ;;  %71 = vadd.xlane.f32.xlu0 %v70_v11 }
   0xf   :  { %80 = vadd.xlane.f32.xlu1 %v79_v14  ;;  %77 = vadd.xlane.f32.xlu0 %v76_v15 }
  0x13   :  { %54 = vadd.xlane.f32.xlu1 %v53_v18  ;;  %51 = vadd.xlane.f32.xlu0 %v50_v19 }
  0x17   :  { %60 = vadd.xlane.f32.xlu1 %v59_v22  ;;  %57 = vadd.xlane.f32.xlu0 %v56_v23 }
  0x1b   :  { %86 = vadd.xlane.f32.xlu1 %v85_v26  ;;  %83 = vadd.xlane.f32.xlu0 %v82_v27 }
  0x1f   :  { %92 = vadd.xlane.f32.xlu1 %v91_v30  ;;  %89 = vadd.xlane.f32.xlu0 %v88_v31 }
  0x8c   :  { %v46_v34 = vpop.xlane.xlu1 %45  ;;  %v40_v35 = vpop.xlane.xlu0 %39 }
  0x8d   :  { %v735_v38 = vmul.f32 0.03125, %v40_v35  ;;  %v739_v40 = vmul.f32 0.03125, %v46_v34 }
  0x8f   :  { %v110_v44 = vmul.f32 %v735_v38, %v735_v38  ;;  %v112_v50 = vmul.f32 %v739_v40, %v739_v40  ;;  %v134_v35 = vsub.f32 %v657_v1, %v735_v38 }
  0x90   :  { %v49_v36 = vpop.xlane.xlu1 %48  ;;  %v43_v37 = vpop.xlane.xlu0 %42 }
  0x91   :  { %v737_v39 = vmul.f32 0.03125, %v43_v37  ;;  %v741_v41 = vmul.f32 0.03125, %v49_v36 }
  0x93   :  { %v111_v45 = vmul.f32 %v737_v39, %v737_v39  ;;  %v113_v51 = vmul.f32 %v741_v41, %v741_v41  ;;  %v135_v36 = vsub.f32 %v671_v5, %v737_v39  ;;  %v496_v39 = vld [vmem:[%s866_s2] ss:$0 sm:$0xff] }
  0x94   :  { %v75_v42 = vpop.xlane.xlu1 %74  ;;  %v72_v43 = vpop.xlane.xlu0 %71 }
  0x95   :  { %v103_v46 = vmul.f32 0.03125, %v75_v42  ;;  %v102_v47 = vmul.f32 0.03125, %v72_v43 }
  0x97   :  { %v119_v48 = vsub.f32 %v103_v46, %v111_v45  ;;  %v118_v49 = vsub.f32 %v102_v47, %v110_v44  ;;  %v495_v46 = vld [vmem:[%s865_s1] ss:$0 sm:$0xff] }
  0x98   :  { %v81_v52 = vpop.xlane.xlu1 %80  ;;  %v78_v53 = vpop.xlane.xlu0 %77 }
  0x99   :  { %v127_v54 = vmax.f32 %v119_v48, 0.0  ;;  %v126_v55 = vmax.f32 %v118_v49, 0.0  ;;  %v105_v56 = vmul.f32 0.03125, %v81_v52  ;;  %v104_v57 = vmul.f32 0.03125, %v78_v53 }
  0x9a   :  { %v137_v49 = vsub.f32 %v662_v2, %v741_v41  ;;  %v136_v52 = vsub.f32 %v652_v0, %v739_v40 }
  0x9b   :  { %v143_v58 = vadd.f32 1e-05, %v127_v54  ;;  %v142_v59 = vadd.f32 1e-05, %v126_v55  ;;  %v121_v60 = vsub.f32 %v105_v56, %v113_v51  ;;  %v120_v61 = vsub.f32 %v104_v57, %v112_v50 }
  0x9c   :  { %v55_v62 = vpop.xlane.xlu1 %54  ;;  %v52_v63 = vpop.xlane.xlu0 %51 }
  0x9d   :  { %561 = vrsqrt.f32 %v143_v58  ;;  %v129_v3 = vmax.f32 %v121_v60, 0.0  ;;  %v128_v4 = vmax.f32 %v120_v61, 0.0  ;;  %v751_v10 = vmul.f32 0.03125, %v55_v62 }
  0x9e   :  { %563 = vrsqrt.f32 %v142_v59  ;;  %v753_v11 = vmul.f32 0.03125, %v52_v63 }
  0x9f   :  { %v145_v6 = vadd.f32 1e-05, %v129_v3  ;;  %v144_v7 = vadd.f32 1e-05, %v128_v4  ;;  %v115_v18 = vmul.f32 %v751_v10, %v751_v10 }
  0xa0   :  { %v61_v8 = vpop.xlane.xlu1 %60  ;;  %v58_v9 = vpop.xlane.xlu0 %57  ;;  %v114_v19 = vmul.f32 %v753_v11, %v753_v11 }
  0xa1   :  { %565 = vrsqrt.f32 %v145_v6  ;;  %v755_v12 = vmul.f32 0.03125, %v61_v8  ;;  %v757_v13 = vmul.f32 0.03125, %v58_v9  ;;  %v139_v6 = vsub.f32 %v692_v16, %v751_v10 }
  0xa2   :  { %567 = vrsqrt.f32 %v144_v7  ;;  %v138_v8 = vsub.f32 %v697_v17, %v753_v11 }
  0xa3   :  { %v117_v26 = vmul.f32 %v755_v12, %v755_v12  ;;  %v116_v27 = vmul.f32 %v757_v13, %v757_v13 }
  0xa4   :  { %v87_v14 = vpop.xlane.xlu1 %86  ;;  %v84_v15 = vpop.xlane.xlu0 %83 }
  0xa5   :  { %v107_v22 = vmul.f32 0.03125, %v87_v14  ;;  %v106_v23 = vmul.f32 0.03125, %v84_v15 }
  0xa7   :  { %v123_v24 = vsub.f32 %v107_v22, %v115_v18  ;;  %v122_v25 = vsub.f32 %v106_v23, %v114_v19  ;;  %v141_v18 = vsub.f32 %v706_v20, %v755_v12  ;;  %v140_v23 = vsub.f32 %v711_v21, %v757_v13  ;;  %v557_v12 = vld [vmem:[%s867_s5 + $0x18] sm:$0xff]   ;;  %v558_v13 = vld [vmem:[%s867_s5 + $0x10] sm:$0xff]  }
  0xa8   :  { %v93_v28 = vpop.xlane.xlu1 %92  ;;  %v90_v29 = vpop.xlane.xlu0 %89  ;;  %539 = vmatprep.subr.bf16.mxu1 %v557_v12 }
  0xa9   :  { %v131_v30 = vmax.f32 %v123_v24, 0.0  ;;  %v130_v31 = vmax.f32 %v122_v25, 0.0  ;;  %v109_v32 = vmul.f32 0.03125, %v93_v28  ;;  %v108_v33 = vmul.f32 0.03125, %v90_v29  ;;  %540 = vmatpush3.bf16.msra.mxu1 %v557_v12 }
  0xaa   :  { %v562_v34 = vpop.eup %561  ;;  %541 = vmatprep.subr.bf16.mxu1 %v558_v13 }
  0xab   :  { %v564_v37 = vpop.eup %563  ;;  %v147_v42 = vadd.f32 1e-05, %v131_v30  ;;  %v146_v43 = vadd.f32 1e-05, %v130_v31  ;;  %v125_v44 = vsub.f32 %v109_v32, %v117_v26  ;;  %v124_v45 = vsub.f32 %v108_v33, %v116_v27 }
  0xac   :  { %v158_v47 = vmul.f32 %v564_v37, %v134_v35  ;;  %v159_v48 = vmul.f32 %v562_v34, %v135_v36  ;;  %v559_v34 = vld [vmem:[%s867_s5 + $0x8] sm:$0xff]   ;;  %v560_v35 = vld [vmem:[%s867_s5] sm:$0xff]  }
  0xad   :  { %569 = vrsqrt.f32 %v147_v42  ;;  %v133_v50 = vmax.f32 %v125_v44, 0.0  ;;  %v132_v38 = vmax.f32 %v124_v45, 0.0  ;;  %542 = vmatpush3.bf16.msra.mxu1 %v558_v13  ;;  %v497_v36 = vld [vmem:[%s868_s4] ss:$0 sm:$0xff] }
  0xae   :  { %v566_v51 = vpop.eup %565  ;;  %571 = vrsqrt.f32 %v146_v43  ;;  %v172_v53 = vmul.f32 %v495_v46, %v158_v47  ;;  %v173_v54 = vmul.f32 %v495_v46, %v159_v48  ;;  %543 = vmatprep.subr.bf16.mxu1 %v559_v34 }
  0xaf   :  { %v568_v55 = vpop.eup %567  ;;  %v149_v56 = vadd.f32 1e-05, %v133_v50  ;;  %v148_v57 = vadd.f32 1e-05, %v132_v38  ;;  %v161_v58 = vmul.f32 %v566_v51, %v137_v49 }
  0xb0   :  { %v186_v59 = vadd.f32 %v496_v39, %v172_v53  ;;  %v187_v41 = vadd.f32 %v496_v39, %v173_v54  ;;  %v160_v60 = vmul.f32 %v568_v55, %v136_v52 }
  0xb1   :  { %573 = vrsqrt.f32 %v149_v56  ;;  %v175_v61 = vmul.f32 %v495_v46, %v161_v58  ;;  %544 = vmatpush3.bf16.msra.mxu1 %v559_v34 }
  0xb2   :  { %575 = vrsqrt.f32 %v148_v57  ;;  %v194_v62 = vpack.c.bf16 %v187_v41, %v186_v59  ;;  %v174_v63 = vmul.f32 %v495_v46, %v160_v60  ;;  %545 = vmatprep.subr.bf16.mxu1 %v560_v35 }
  0xb3   :  { %v189_v3 = vadd.f32 %v496_v39, %v175_v61 }
  0xb4   :  { %531 = vmatprep.mubr.msk.bf16.mxu0 %vm37_vm0, %v194_v62  ;;  %v188_v4 = vadd.f32 %v496_v39, %v174_v63 }
  0xb5   :  { %546 = vmatpush3.bf16.msra.mxu1 %v560_v35 }
  0xb6   :  { %v195_v40 = vpack.c.bf16 %v189_v3, %v188_v4 }
  0xb8   :  { %532 = vmatmul.mubr.msk.bf16.vlgmr.msra.gmra.mxu0 %vm37_vm0, %v195_v40 }
  0xba   :  { %v570_v7 = vpop.eup %569 }
  0xbb   :  { %v572_v9 = vpop.eup %571  ;;  %v163_v14 = vmul.f32 %v570_v7, %v139_v6 }
  0xbc   :  { %v162_v15 = vmul.f32 %v572_v9, %v138_v8 }
  0xbd   :  { %v177_v19 = vmul.f32 %v495_v46, %v163_v14 }
  0xbe   :  { %v574_v22 = vpop.eup %573  ;;  %v176_v24 = vmul.f32 %v495_v46, %v162_v15 }
  0xbf   :  { %v576_v25 = vpop.eup %575  ;;  %v191_v26 = vadd.f32 %v496_v39, %v177_v19  ;;  %v165_v27 = vmul.f32 %v574_v22, %v141_v18 }
  0xc0   :  { %v190_v10 = vadd.f32 %v496_v39, %v176_v24  ;;  %v164_v28 = vmul.f32 %v576_v25, %v140_v23 }
  0xc1   :  { %v179_v29 = vmul.f32 %v495_v46, %v165_v27 }
  0xc2   :  { %v196_v30 = vpack.c.bf16 %v191_v26, %v190_v10  ;;  %v178_v11 = vmul.f32 %v495_v46, %v164_v28 }
  0xc3   :  { %v193_v31 = vadd.f32 %v496_v39, %v179_v29 }
  0xc4   :  { %535 = vmatprep.mubr.msk.bf16.mxu0 %vm37_vm0, %v196_v30  ;;  %v192_v32 = vadd.f32 %v496_v39, %v178_v11 }
  0xc6   :  { %v197_v33 = vpack.c.bf16 %v193_v31, %v192_v32 }
  0xc8   :  { %536 = vmatmul.mubr.msk.bf16.gmra.mxu0 %vm37_vm0, %v197_v33 }
 0x178   :  { %v533_v37 = vpop.f32.mrf.mxu0 }
 0x179   :  { %v808_v42 = vadd.f32 %v533_v37, %v497_v36 }
 0x17a   :  { %v267_v43 = vpop.f32.mrf.mxu0 }
 0x17b   :  { %v300_v44 = vsub.f32 0.0, %v808_v42  ;;  %v268_v45 = vadd.f32 %v497_v36, %v267_v43 }
 0x17c   :  { %v534_v46 = vpop.f32.mrf.mxu0 }
 0x17d   :  { %v310_v47 = vmul.f32 1.442695, %v300_v44  ;;  %v298_v48 = vsub.f32 0.0, %v268_v45  ;;  %v279_v49 = vadd.f32 %v534_v46, %v497_v36 }
 0x17e   :  { %v270_v50 = vpop.f32.mrf.mxu0 }
 0x17f   :  { %577 = vpow2.f32 %v310_v47  ;;  %v306_v38 = vmul.f32 1.442695, %v298_v48  ;;  %v301_v39 = vsub.f32 0.0, %v279_v49  ;;  %v271_v51 = vadd.f32 %v497_v36, %v270_v50 }
 0x181   :  { %579 = vpow2.f32 %v306_v38  ;;  %v312_v52 = vmul.f32 1.442695, %v301_v39  ;;  %v299_v53 = vsub.f32 0.0, %v271_v51 }
 0x183   :  { %581 = vpow2.f32 %v312_v52  ;;  %v308_v54 = vmul.f32 1.442695, %v299_v53 }
 0x185   :  { %583 = vpow2.f32 %v308_v54 }
 0x188   :  { %v537_v55 = vpop.f32.mrf.mxu0 }
 0x189   :  { %v811_v56 = vadd.f32 %v537_v55, %v497_v36 }
 0x18a   :  { %v283_v57 = vpop.f32.mrf.mxu0 }
 0x18b   :  { %v304_v58 = vsub.f32 0.0, %v811_v56  ;;  %v284_v59 = vadd.f32 %v497_v36, %v283_v57 }
 0x18c   :  { %v578_v41 = vpop.eup %577  ;;  %v538_v60 = vpop.f32.mrf.mxu0 }
 0x18d   :  { %v324_v61 = vadd.f32 1.0, %v578_v41  ;;  %v318_v62 = vmul.f32 1.442695, %v304_v58  ;;  %v302_v63 = vsub.f32 0.0, %v284_v59  ;;  %v295_v3 = vadd.f32 %v538_v60, %v497_v36 }
 0x18e   :  { %v580_v4 = vpop.eup %579  ;;  %v286_v40 = vpop.f32.mrf.mxu0 }
 0x18f   :  { %585 = vrcp.f32 %v324_v61  ;;  %v322_v6 = vadd.f32 1.0, %v580_v4  ;;  %v314_v7 = vmul.f32 1.442695, %v302_v63  ;;  %v305_v8 = vsub.f32 0.0, %v295_v3 }
 0x190   :  { %v582_v9 = vpop.eup %581  ;;  %587 = vpow2.f32 %v318_v62  ;;  %v287_v14 = vadd.f32 %v497_v36, %v286_v40 }
 0x191   :  { %589 = vrcp.f32 %v322_v6  ;;  %v325_v15 = vadd.f32 1.0, %v582_v9  ;;  %v320_v18 = vmul.f32 1.442695, %v305_v8 }
 0x192   :  { %v584_v19 = vpop.eup %583  ;;  %591 = vpow2.f32 %v314_v7  ;;  %v303_v22 = vsub.f32 0.0, %v287_v14 }
 0x193   :  { %593 = vrcp.f32 %v325_v15  ;;  %v323_v23 = vadd.f32 1.0, %v584_v19 }
 0x194   :  { %595 = vpow2.f32 %v320_v18  ;;  %v316_v24 = vmul.f32 1.442695, %v303_v22 }
 0x195   :  { %597 = vrcp.f32 %v323_v23 }
 0x196   :  { %599 = vpow2.f32 %v316_v24 }
 0x19c   :  { %v586_v25 = vpop.eup %585 }
 0x19d   :  { %v588_v26 = vpop.eup %587  ;;  %v348_v35 = vmul.f32 %v586_v25, %v808_v42 }
 0x19e   :  { %v590_v27 = vpop.eup %589  ;;  %v328_v11 = vadd.f32 1.0, %v588_v26 }
 0x19f   :  { %v592_v10 = vpop.eup %591  ;;  %v346_v13 = vmul.f32 %v590_v27, %v268_v45 }
 0x1a0   :  { %v594_v28 = vpop.eup %593  ;;  %v326_v29 = vadd.f32 1.0, %v592_v10 }
 0x1a1   :  { %v596_v30 = vpop.eup %595  ;;  %v349_v32 = vmul.f32 %v594_v28, %v279_v49 }
 0x1a2   :  { %v598_v31 = vpop.eup %597  ;;  %v329_v33 = vadd.f32 1.0, %v596_v30  ;;  %601 = vrcp.f32 %v326_v29 }
 0x1a3   :  { %v600_v12 = vpop.eup %599  ;;  %v347_v34 = vmul.f32 %v598_v31, %v271_v51  ;;  %v355_v43 = vpack.c.bf16 %v349_v32, %v348_v35  ;;  %v504_v51 = vld [vmem:[%s869_s6] ss:$0 sm:$0xff] }
 0x1a4   :  { %603 = vrcp.f32 %v329_v33  ;;  %v327_v36 = vadd.f32 1.0, %v600_v12 }
 0x1a5   :  { %605 = vrcp.f32 %v328_v11  ;;  %v354_v37 = vpack.c.bf16 %v347_v34, %v346_v13 }
 0x1a6   :  { %607 = vrcp.f32 %v327_v36 }
 0x1a7   :  { %547 = vmatprep.mubr.msk.bf16.mxu1 %vm397_vm1, %v354_v37 }
 0x1a8   :  { %548 = vmatmul.mubr.msk.bf16.vlgmr.msra.gmra.mxu1 %vm397_vm1, %v355_v43 }
 0x1af   :  { %v602_v44 = vpop.eup %601 }
 0x1b0   :  { %v350_v49 = vmul.f32 %v602_v44, %v284_v59 }
 0x1b1   :  { %v604_v46 = vpop.eup %603 }
 0x1b2   :  { %v606_v47 = vpop.eup %605  ;;  %v353_v45 = vmul.f32 %v604_v46, %v295_v3 }
 0x1b3   :  { %v608_v48 = vpop.eup %607  ;;  %v352_v42 = vmul.f32 %v606_v47, %v811_v56 }
 0x1b4   :  { %v351_v50 = vmul.f32 %v608_v48, %v287_v14 }
 0x1b5   :  { %v357_v39 = vpack.c.bf16 %v353_v45, %v352_v42 }
 0x1b6   :  { %v356_v38 = vpack.c.bf16 %v351_v50, %v350_v49 }
 0x1b8   :  { %551 = vmatprep.mubr.msk.bf16.mxu1 %vm397_vm1, %v356_v38 }
 0x1b9   :  { %552 = vmatmul.mubr.msk.bf16.gmra.mxu1 %vm397_vm1, %v357_v39 }
 0x268   :  { %v549_v52 = vpop.f32.mrf.mxu1 }
 0x269   :  { %v453_v53 = vadd.f32 %v549_v52, %v504_v51 }
 0x26a   :  { %v444_v54 = vpop.f32.mrf.mxu1 }
 0x26b   :  { %v477_v55 = vadd.f32 %v453_v53, %v652_v0  ;;  %v445_v57 = vadd.f32 %v504_v51, %v444_v54 }
 0x26c   :  { %v550_v58 = vpop.f32.mrf.mxu1 }
 0x26d   :  { %485 = vst.msk [vmem:[%s870_s7 + $0x10] sm:$0xff] %vm37_vm0, %v477_v55  ;;  %v475_v56 = vadd.f32 %v445_v57, %v657_v1  ;;  %v456_v59 = vadd.f32 %v550_v58, %v504_v51 }
 0x26e   :  { %v447_v41 = vpop.f32.mrf.mxu1 }
 0x26f   :  { %483 = vst.msk [vmem:[%s870_s7] sm:$0xff] %vm37_vm0, %v475_v56  ;;  %v478_v60 = vadd.f32 %v456_v59, %v662_v2  ;;  %v448_v61 = vadd.f32 %v504_v51, %v447_v41 }
 0x271   :  { %486 = vst.msk [vmem:[%s870_s7 + $0x18] sm:$0xff] %vm37_vm0, %v478_v60  ;;  %v476_v0 = vadd.f32 %v448_v61, %v671_v5 }
 0x273   :  { %484 = vst.msk [vmem:[%s870_s7 + $0x8] sm:$0xff] %vm37_vm0, %v476_v0 }
 0x279   :  { %v553_v1 = vpop.f32.mrf.mxu1 }
 0x27a   :  { %v469_v62 = vadd.f32 %v553_v1, %v504_v51 }
 0x27b   :  { %v460_v63 = vpop.f32.mrf.mxu1 }
 0x27c   :  { %v481_v3 = vadd.f32 %v469_v62, %v711_v21  ;;  %v461_v4 = vadd.f32 %v504_v51, %v460_v63 }
 0x27d   :  { %v554_v2 = vpop.f32.mrf.mxu1 }
 0x27e   :  { %489 = vst.msk [vmem:[%s870_s7 + $0x30] sm:$0xff] %vm37_vm0, %v481_v3  ;;  %v479_v40 = vadd.f32 %v461_v4, %v697_v17  ;;  %v472_v5 = vadd.f32 %v554_v2, %v504_v51 }
 0x27f   :  { %v463_v6 = vpop.f32.mrf.mxu1 }
 0x280   :  { %487 = vst.msk [vmem:[%s870_s7 + $0x20] sm:$0xff] %vm37_vm0, %v479_v40  ;;  %v482_v7 = vadd.f32 %v472_v5, %v706_v20  ;;  %v464_v8 = vadd.f32 %v504_v51, %v463_v6 }
 0x282   :  { %490 = vst.msk [vmem:[%s870_s7 + $0x38] sm:$0xff] %vm37_vm0, %v482_v7  ;;  %v480_v21 = vadd.f32 %v464_v8, %v692_v16 }
 0x284   :  { %488 = vst.msk [vmem:[%s870_s7 + $0x28] sm:$0xff] %vm37_vm0, %v480_v21 }

</bundles_post_ra>
